<compile_context>
chip_gen: v7x
topology: tpu7x:2x2x1
jax: 0.10.0
libtpu: 0.0.40
codegen_flags: <defaults>
</compile_context>

<pallas_src>
import functools

import jax
import jax.numpy as jnp
from jax.experimental import pallas as pl
from jax.experimental.pallas import tpu as pltpu


# ----------------------------- kernel helpers ------------------------------

def _rmsnorm(x, w):
    # x: [S, D] f32, w: [1, D] f32  (matches torch RMSNorm, eps=1e-6)
    ms = jnp.mean(x * x, axis=-1, keepdims=True)
    return x * jax.lax.rsqrt(ms + 1e-6) * w


# ----------------------- fused transformer stack kernel ---------------------
#
# grid = (B, L): batch parallel, layer sequential.  The residual stream for
# the current batch element lives in x_acc (VMEM, f32) across all L steps.

def block_stack_kernel(num_heads,
                       x_ref, cos_ref, sins_ref, mask_ref,
                       n1_ref, wq_ref, bq_ref, wk_ref, bk_ref, wv_ref, bv_ref,
                       wo_ref, bo_ref, n2_ref, w1_ref, b1_ref, w2_ref, b2_ref,
                       o_ref, x_acc, attn_acc):
    layer = pl.program_id(1)
    S, D = x_acc.shape
    hd = D // num_heads          # head dim (canonical layout)
    half = hd // 2               # complex pairs per head
    Dh = D // 2

    @pl.when(layer == 0)
    def _():
        x_acc[...] = x_ref[0].astype(jnp.float32)

    x = x_acc[...]                                            # [S, D] f32

    # ------------------------- attention branch -----------------------------
    h = _rmsnorm(x, n1_ref[0]).astype(jnp.bfloat16)
    q = jnp.dot(h, wq_ref[0], preferred_element_type=jnp.float32) + bq_ref[0]
    k = jnp.dot(h, wk_ref[0], preferred_element_type=jnp.float32) + bk_ref[0]
    v = (jnp.dot(h, wv_ref[0], preferred_element_type=jnp.float32)
         + bv_ref[0]).astype(jnp.bfloat16)

    # RoPE in the permuted layout: col p in [0, D/2) holds the "real" part of
    # pair (head, i) and col D/2 + p its "imag" part, so rotation by
    # exp(i*theta) is one half-width lane roll (direction agnostic since
    # shift == D/2) plus elementwise mul/add.
    cos = cos_ref[...]
    sins = sins_ref[...]
    q = (q * cos + pltpu.roll(q, Dh, axis=1) * sins).astype(jnp.bfloat16)
    k = (k * cos + pltpu.roll(k, Dh, axis=1) * sins).astype(jnp.bfloat16)

    bias = mask_ref[...]                                      # 0 / -1e30
    scale = 1.0 / float(hd) ** 0.5
    dn = (((1,), (1,)), ((), ()))                             # q @ k^T

    # Per-head attention (static loop of 2-D dots; outputs written straight
    # into a VMEM slab — no concatenate of narrow slices).
    for hh in range(num_heads):
        r0 = hh * half
        qr = q[:, r0:r0 + half]
        qi = q[:, Dh + r0:Dh + r0 + half]
        kr = k[:, r0:r0 + half]
        ki = k[:, Dh + r0:Dh + r0 + half]
        s = jax.lax.dot_general(qr, kr, dn, preferred_element_type=jnp.float32)
        s = s + jax.lax.dot_general(qi, ki, dn, preferred_element_type=jnp.float32)
        s = s * scale + bias
        s = s - jnp.max(s, axis=-1, keepdims=True)
        p = jnp.exp(s)
        p = p * pl.reciprocal(jnp.sum(p, axis=-1, keepdims=True), approx=True)
        vh = v[:, hh * hd:(hh + 1) * hd]                      # canonical layout
        oh = jnp.dot(p.astype(jnp.bfloat16), vh,
                     preferred_element_type=jnp.float32)
        attn_acc[:, hh * hd:(hh + 1) * hd] = oh.astype(attn_acc.dtype)

    attn = jnp.dot(attn_acc[...], wo_ref[0],
                   preferred_element_type=jnp.float32) + bo_ref[0]
    x = x + attn

    # ---------------------------- FFN branch ---------------------------------
    h2 = _rmsnorm(x, n2_ref[0]).astype(jnp.bfloat16)
    m = jnp.dot(h2, w1_ref[0], preferred_element_type=jnp.float32) + b1_ref[0]
    m = (m * jax.nn.sigmoid(m)).astype(jnp.bfloat16)          # SiLU in f32
    f = jnp.dot(m, w2_ref[0], preferred_element_type=jnp.float32) + b2_ref[0]
    x = x + f

    x_acc[...] = x

    @pl.when(layer == pl.num_programs(1) - 1)
    def _():
        o_ref[0] = x.astype(o_ref.dtype)


def run_blocks(x, cos, sins, mask, pp, num_heads):
    B, S, D = x.shape
    L = pp["wq"].shape[0]
    M = pp["w1"].shape[2]

    def const(shape):
        n = len(shape)
        return pl.BlockSpec(shape, lambda b, l, _n=n: (0,) * _n)

    def per_layer(shape):
        n = len(shape)
        return pl.BlockSpec((1,) + shape, lambda b, l, _n=n: (l,) + (0,) * _n)

    in_specs = [
        pl.BlockSpec((1, S, D), lambda b, l: (b, 0, 0)),      # x
        const((S, D)), const((S, D)), const((S, S)),          # cos, sin_signed, mask
        per_layer((1, D)),                                    # norm1
        per_layer((D, D)), per_layer((1, D)),                 # wq, bq
        per_layer((D, D)), per_layer((1, D)),                 # wk, bk
        per_layer((D, D)), per_layer((1, D)),                 # wv, bv
        per_layer((D, D)), per_layer((1, D)),                 # wo, bo
        per_layer((1, D)),                                    # norm2
        per_layer((D, M)), per_layer((1, M)),                 # fc1
        per_layer((M, D)), per_layer((1, D)),                 # fc2
    ]
    return pl.pallas_call(
        functools.partial(block_stack_kernel, num_heads),
        out_shape=jax.ShapeDtypeStruct((B, S, D), jnp.float32),
        grid=(B, L),
        in_specs=in_specs,
        out_specs=pl.BlockSpec((1, S, D), lambda b, l: (b, 0, 0)),
        scratch_shapes=[pltpu.VMEM((S, D), jnp.float32),      # residual stream
                        pltpu.VMEM((S, D), jnp.bfloat16)],    # attn head slab
        compiler_params=pltpu.CompilerParams(
            dimension_semantics=("parallel", "arbitrary")),
    )(x, cos, sins, mask,
      pp["n1"], pp["wq"], pp["bq"], pp["wk"], pp["bk"], pp["wv"], pp["bv"],
      pp["wo"], pp["bo"], pp["n2"], pp["w1"], pp["b1"], pp["w2"], pp["b2"])


# -------------------- final RMSNorm + vocab-tiled LM head -------------------

def head_kernel(x_ref, nw_ref, hw_ref, o_ref, h_acc):
    @pl.when(pl.program_id(1) == 0)
    def _():
        xx = x_ref[0].astype(jnp.float32)
        h_acc[...] = _rmsnorm(xx, nw_ref[...]).astype(jnp.bfloat16)
    o_ref[0] = jnp.dot(h_acc[...], hw_ref[...],
                       preferred_element_type=jnp.float32).astype(o_ref.dtype)


def run_head(x, norm_w, head_w):
    B, S, D = x.shape
    V = head_w.shape[1]
    tn = V
    for cand in (2048, 1024, 512, 256, 128):
        if V % cand == 0:
            tn = cand
            break
    nv = V // tn
    return pl.pallas_call(
        head_kernel,
        out_shape=jax.ShapeDtypeStruct((B, S, V), jnp.float32),
        grid=(B, nv),
        in_specs=[
            pl.BlockSpec((1, S, D), lambda b, n: (b, 0, 0)),
            pl.BlockSpec((1, D), lambda b, n: (0, 0)),
            pl.BlockSpec((D, tn), lambda b, n: (0, n)),
        ],
        out_specs=pl.BlockSpec((1, S, tn), lambda b, n: (b, 0, n)),
        scratch_shapes=[pltpu.VMEM((S, D), jnp.bfloat16)],
        compiler_params=pltpu.CompilerParams(
            dimension_semantics=("parallel", "arbitrary")),
    )(x, norm_w, head_w)


# ------------------------------ model setup ---------------------------------

def init_params(key, num_layers, num_heads, embed_dim, vocab_size, mlp_dim):
    """Canonical (torch-layout, f32) parameters.  Linear weights are stored
    transposed [in, out] so kernels compute x @ W + b."""
    std = 0.02
    D = embed_dim
    keys = jax.random.split(key, 2 + num_layers)
    params = {
        "tok_emb": jax.random.normal(keys[0], (vocab_size, D), jnp.float32) * std,
        "head_w": jax.random.normal(keys[1], (D, vocab_size), jnp.float32) * std,
        "final_norm": jnp.ones((1, D), jnp.float32),
        "layers": [],
    }
    for li in range(num_layers):
        lk = jax.random.split(keys[2 + li], 12)
        # torch init zeroes biases and uses unit norm weights; we give them
        # small non-trivial values to exercise every path in the correctness
        # check (forward semantics are init-agnostic).
        params["layers"].append({
            "n1": 1.0 + 0.1 * jax.random.normal(lk[6], (1, D), jnp.float32),
            "wq": jax.random.normal(lk[0], (D, D), jnp.float32) * std,
            "bq": jax.random.normal(lk[7], (1, D), jnp.float32) * std,
            "wk": jax.random.normal(lk[1], (D, D), jnp.float32) * std,
            "bk": jax.random.normal(lk[8], (1, D), jnp.float32) * std,
            "wv": jax.random.normal(lk[2], (D, D), jnp.float32) * std,
            "bv": jax.random.normal(lk[9], (1, D), jnp.float32) * std,
            "wo": jax.random.normal(lk[3], (D, D), jnp.float32) * std,
            "bo": jax.random.normal(lk[10], (1, D), jnp.float32) * std,
            "n2": 1.0 + 0.1 * jax.random.normal(lk[11], (1, D), jnp.float32),
            "w1": jax.random.normal(lk[4], (D, mlp_dim), jnp.float32) * std,
            "b1": jnp.zeros((1, mlp_dim), jnp.float32),
            "w2": jax.random.normal(lk[5], (mlp_dim, D), jnp.float32) * std,
            "b2": jnp.zeros((1, D), jnp.float32),
        })
    return params


def rope_permutation(num_heads, head_dim):
    """Permuted column p = h*half + i  <- canonical column h*head_dim + 2i
       (real parts);   D/2 + p         <- canonical column h*head_dim + 2i + 1
       (imag parts)."""
    half = head_dim // 2
    heads = jnp.arange(num_heads)[:, None]
    pairs = jnp.arange(half)[None, :]
    real_src = (heads * head_dim + 2 * pairs).reshape(-1)
    imag_src = (heads * head_dim + 2 * pairs + 1).reshape(-1)
    return jnp.concatenate([real_src, imag_src], axis=0)


def prepare_params(raw, num_heads):
    """Permute q/k projections into the RoPE roll layout, cast matmul weights
    to bf16, and stack per-layer tensors along a leading L axis."""
    D = raw["layers"][0]["wq"].shape[0]
    hd = D // num_heads
    perm = rope_permutation(num_heads, hd)
    bf16 = jnp.bfloat16

    def stack(fn):
        return jnp.stack([fn(lp) for lp in raw["layers"]], axis=0)

    return {
        "n1": stack(lambda lp: lp["n1"]),
        "wq": stack(lambda lp: lp["wq"][:, perm].astype(bf16)),
        "bq": stack(lambda lp: lp["bq"][:, perm]),
        "wk": stack(lambda lp: lp["wk"][:, perm].astype(bf16)),
        "bk": stack(lambda lp: lp["bk"][:, perm]),
        "wv": stack(lambda lp: lp["wv"].astype(bf16)),
        "bv": stack(lambda lp: lp["bv"]),
        "wo": stack(lambda lp: lp["wo"].astype(bf16)),
        "bo": stack(lambda lp: lp["bo"]),
        "n2": stack(lambda lp: lp["n2"]),
        "w1": stack(lambda lp: lp["w1"].astype(bf16)),
        "b1": stack(lambda lp: lp["b1"]),
        "w2": stack(lambda lp: lp["w2"].astype(bf16)),
        "b2": stack(lambda lp: lp["b2"]),
        "tok_emb": raw["tok_emb"],
        "final_norm": raw["final_norm"],
        "head_w": raw["head_w"].astype(bf16),
    }


def rope_tables(seq_len, head_dim, num_heads, theta):
    """cos / signed-sin tables in the permuted layout ([reals | imags])."""
    half = head_dim // 2
    freqs = 1.0 / (theta ** (jnp.arange(0, head_dim, 2,
                                        dtype=jnp.float32)[:half] / head_dim))
    t = jnp.arange(seq_len, dtype=jnp.float32)
    ang = jnp.outer(t, freqs)                                  # [S, half]
    cos_h = jnp.cos(ang)
    sin_h = jnp.sin(ang)
    cos_half = jnp.tile(cos_h, (1, num_heads))                 # [S, D/2]
    sin_half = jnp.tile(sin_h, (1, num_heads))
    cos_full = jnp.concatenate([cos_half, cos_half], axis=1)   # [S, D]
    sin_signed = jnp.concatenate([-sin_half, sin_half], axis=1)
    return cos_full, sin_signed


def gpt_sampler_forward(tok_ids, packed, cfg):
    """GPTSampler.forward (inference): prepend SOS, drop last, run MiniGPT2."""
    B, T = tok_ids.shape
    sos = jnp.full((B, 1), cfg["sos_token_id"], dtype=tok_ids.dtype)
    input_ids = jnp.concatenate([sos, tok_ids], axis=1)[:, :-1]
    S = input_ids.shape[1]
    D = cfg["embed_dim"]
    H = cfg["num_heads"]
    hd = D // H

    # Embedding gather done as a plain XLA gather (data-dependent; not worth a
    # manual DMA-gather kernel at these sizes).
    x = jnp.take(packed["tok_emb"], input_ids, axis=0).astype(jnp.float32)
    cos, sins = rope_tables(S, hd, H, cfg["rope_theta"])
    row = jnp.arange(S)[:, None]
    col = jnp.arange(S)[None, :]
    mask = jnp.where(col <= row, 0.0, -1e30).astype(jnp.float32)

    x = run_blocks(x, cos, sins, mask, packed, H)
    logits = run_head(x, packed["final_norm"], packed["head_w"])
    return {"logits": logits}


# ------------------------ plain-JAX reference (f32) --------------------------

def reference_forward(tok_ids, raw, cfg):
    """Mirrors the torch forward exactly (canonical weights, interleaved
    complex RoPE, f32 throughout) — independent of the kernel formulation."""
    B, T = tok_ids.shape
    D, H = cfg["embed_dim"], cfg["num_heads"]
    hd = D // H
    sos = jnp.full((B, 1), cfg["sos_token_id"], dtype=tok_ids.dtype)
    ids = jnp.concatenate([sos, tok_ids], axis=1)[:, :-1]
    S = ids.shape[1]
    x = raw["tok_emb"][ids]

    freqs = 1.0 / (cfg["rope_theta"] ** (jnp.arange(0, hd, 2,
                                                    dtype=jnp.float32)[:hd // 2] / hd))
    ang = jnp.outer(jnp.arange(S, dtype=jnp.float32), freqs)
    cos, sin = jnp.cos(ang), jnp.sin(ang)
    causal = jnp.tril(jnp.ones((S, S), bool))

    def rms(v, w):
        return v * jax.lax.rsqrt(jnp.mean(v * v, -1, keepdims=True) + 1e-6) * w

    def rope(t):
        tr = t.reshape(B, S, H, hd // 2, 2)
        re, im = tr[..., 0], tr[..., 1]
        c = cos[None, :, None, :]
        s = sin[None, :, None, :]
        return jnp.stack([re * c - im * s, re * s + im * c], -1).reshape(B, S, H, hd)

    for lp in raw["layers"]:
        h = rms(x, lp["n1"])
        q = (h @ lp["wq"] + lp["bq"]).reshape(B, S, H, hd)
        k = (h @ lp["wk"] + lp["bk"]).reshape(B, S, H, hd)
        v = (h @ lp["wv"] + lp["bv"]).reshape(B, S, H, hd)
        q, k = rope(q), rope(k)
        q, k, v = (t.transpose(0, 2, 1, 3) for t in (q, k, v))
        s = (q @ jnp.swapaxes(k, -1, -2)) / jnp.sqrt(jnp.float32(hd))
        s = jnp.where(causal[None, None], s, -jnp.inf)
        p = jax.nn.softmax(s, axis=-1)
        o = (p @ v).transpose(0, 2, 1, 3).reshape(B, S, D)
        x = x + o @ lp["wo"] + lp["bo"]
        h2 = rms(x, lp["n2"])
        m = h2 @ lp["w1"] + lp["b1"]
        m = m * jax.nn.sigmoid(m)
        x = x + m @ lp["w2"] + lp["b2"]
    return rms(x, raw["final_norm"]) @ raw["head_w"]


# --------------------------------- main --------------------------------------

if __name__ == "__main__":
    cfg = dict(
        num_layers=2,
        num_heads=4,
        embed_dim=128,       # lane-dense (multiple of 128); head_dim = 32
        max_seq_len=16,
        vocab_size=256,      # lane-dense
        rope_theta=10000,
        sos_token_id=0,
    )
    key = jax.random.PRNGKey(0)
    pkey, dkey = jax.random.split(key)
    mlp_dim = int(cfg["embed_dim"] * 4.0)

    raw = init_params(pkey, cfg["num_layers"], cfg["num_heads"],
                      cfg["embed_dim"], cfg["vocab_size"], mlp_dim)
    packed = prepare_params(raw, cfg["num_heads"])

    B, T = 2, 8
    tok_ids = jax.random.randint(dkey, (B, T), 0, cfg["vocab_size"], dtype=jnp.int32)

    out = gpt_sampler_forward(tok_ids, packed, cfg)
    logits = jax.block_until_ready(out["logits"])
    assert logits.shape == (B, T, cfg["vocab_size"])
    assert bool(jnp.isfinite(logits).all())

    # Correctness: compare against a full-precision plain-JAX reference of the
    # torch forward (bf16 matmul operands + approx reciprocal bound the gap).
    with jax.default_matmul_precision("highest"):
        ref = jax.block_until_ready(reference_forward(tok_ids, raw, cfg))
    err = float(jnp.max(jnp.abs(logits - ref.astype(jnp.float32))))
    assert err < 1e-1, f"kernel/reference mismatch: max abs err {err}"

    print("KERNEL_OK")
</pallas_src>

<mosaic_0001>
module attributes {stable_mosaic.version = 11 : i64} {
  func.func @block_stack_kernel(%arg0: i32, %arg1: i32, %arg2: memref<1x8x128xf32, #tpu.memory_space<vmem>>, %arg3: memref<8x128xf32, #tpu.memory_space<vmem>>, %arg4: memref<8x128xf32, #tpu.memory_space<vmem>>, %arg5: memref<8x8xf32, #tpu.memory_space<vmem>>, %arg6: memref<1x1x128xf32, #tpu.memory_space<vmem>>, %arg7: memref<1x128x128xbf16, #tpu.memory_space<vmem>>, %arg8: memref<1x1x128xf32, #tpu.memory_space<vmem>>, %arg9: memref<1x128x128xbf16, #tpu.memory_space<vmem>>, %arg10: memref<1x1x128xf32, #tpu.memory_space<vmem>>, %arg11: memref<1x128x128xbf16, #tpu.memory_space<vmem>>, %arg12: memref<1x1x128xf32, #tpu.memory_space<vmem>>, %arg13: memref<1x128x128xbf16, #tpu.memory_space<vmem>>, %arg14: memref<1x1x128xf32, #tpu.memory_space<vmem>>, %arg15: memref<1x1x128xf32, #tpu.memory_space<vmem>>, %arg16: memref<1x128x512xbf16, #tpu.memory_space<vmem>>, %arg17: memref<1x1x512xf32, #tpu.memory_space<vmem>>, %arg18: memref<1x512x128xbf16, #tpu.memory_space<vmem>>, %arg19: memref<1x1x128xf32, #tpu.memory_space<vmem>>, %arg20: memref<1x8x128xf32, #tpu.memory_space<vmem>>, %arg21: memref<8x128xf32, #tpu.memory_space<vmem>>, %arg22: memref<8x128xbf16, #tpu.memory_space<vmem>>) attributes {dimension_semantics = [#tpu.dimension_semantics<parallel>, #tpu.dimension_semantics<arbitrary>], iteration_bounds = array<i64: 2, 2>, scalar_prefetch = 0 : i64, scratch_operands = 2 : i64, tpu.core_type = #tpu.core_type<tc>, window_params = [{transform_indices = @transform_0, window_bounds = array<i64: 1, 8, 128>}, {pipeline_mode = #tpu.pipeline_mode<synchronous>, transform_indices = @transform_1, window_bounds = array<i64: 8, 128>}, {pipeline_mode = #tpu.pipeline_mode<synchronous>, transform_indices = @transform_2, window_bounds = array<i64: 8, 128>}, {pipeline_mode = #tpu.pipeline_mode<synchronous>, transform_indices = @transform_3, window_bounds = array<i64: 8, 8>}, {transform_indices = @transform_4, window_bounds = array<i64: 1, 1, 128>}, {transform_indices = @transform_5, window_bounds = array<i64: 1, 128, 128>}, {transform_indices = @transform_6, window_bounds = array<i64: 1, 1, 128>}, {transform_indices = @transform_7, window_bounds = array<i64: 1, 128, 128>}, {transform_indices = @transform_8, window_bounds = array<i64: 1, 1, 128>}, {transform_indices = @transform_9, window_bounds = array<i64: 1, 128, 128>}, {transform_indices = @transform_10, window_bounds = array<i64: 1, 1, 128>}, {transform_indices = @transform_11, window_bounds = array<i64: 1, 128, 128>}, {transform_indices = @transform_12, window_bounds = array<i64: 1, 1, 128>}, {transform_indices = @transform_13, window_bounds = array<i64: 1, 1, 128>}, {transform_indices = @transform_14, window_bounds = array<i64: 1, 128, 512>}, {transform_indices = @transform_15, window_bounds = array<i64: 1, 1, 512>}, {transform_indices = @transform_16, window_bounds = array<i64: 1, 512, 128>}, {transform_indices = @transform_17, window_bounds = array<i64: 1, 1, 128>}, {transform_indices = @transform_18, window_bounds = array<i64: 1, 8, 128>}]} {
    %c0_i32 = arith.constant 0 : i32
    %0 = arith.cmpi eq, %arg1, %c0_i32 : i32
    %1 = arith.extui %0 : i1 to i32
    %c0_i32_0 = arith.constant 0 : i32
    %2 = arith.cmpi ne, %1, %c0_i32_0 : i32
    scf.if %2 {
      %c0_97 = arith.constant 0 : index
      %c0_98 = arith.constant 0 : index
      %c0_99 = arith.constant 0 : index
      %204 = vector.load %arg2[%c0_97, %c0_98, %c0_99] : memref<1x8x128xf32, #tpu.memory_space<vmem>>, vector<1x8x128xf32>
      %205 = vector.shape_cast %204 : vector<1x8x128xf32> to vector<8x128xf32>
      %c0_100 = arith.constant 0 : index
      %c0_101 = arith.constant 0 : index
      %206 = vector.load %arg21[%c0_100, %c0_101] : memref<8x128xf32, #tpu.memory_space<vmem>>, vector<8x128xf32>
      tpu.vector_store %arg21[%c0_100, %c0_101], %205 {strides = array<i32>} : memref<8x128xf32, #tpu.memory_space<vmem>>, vector<8x128xf32>,
    } else {
    }
    %c0 = arith.constant 0 : index
    %c0_1 = arith.constant 0 : index
    %3 = vector.load %arg21[%c0, %c0_1] : memref<8x128xf32, #tpu.memory_space<vmem>>, vector<8x128xf32>
    %c0_2 = arith.constant 0 : index
    %c0_3 = arith.constant 0 : index
    %c0_4 = arith.constant 0 : index
    %4 = vector.load %arg6[%c0_2, %c0_3, %c0_4] : memref<1x1x128xf32, #tpu.memory_space<vmem>>, vector<1x1x128xf32>
    %5 = vector.shape_cast %4 : vector<1x1x128xf32> to vector<1x128xf32>
    %6 = arith.mulf %3, %3 : vector<8x128xf32>
    %cst = arith.constant dense<0.000000e+00> : vector<8xf32>
    %7 = vector.multi_reduction <add>, %6, %cst [1] : vector<8x128xf32> to vector<8xf32>
    %8 = vector.shape_cast %7 : vector<8xf32> to vector<8x1xf32>
    %cst_5 = arith.constant 1.280000e+02 : f32
    %9 = vector.broadcast %cst_5 : f32 to vector<8x1xf32>
    %10 = arith.divf %8, %9 : vector<8x1xf32>
    %cst_6 = arith.constant 9.99999997E-7 : f32
    %11 = vector.broadcast %cst_6 : f32 to vector<8x1xf32>
    %12 = arith.addf %10, %11 : vector<8x1xf32>
    %13 = math.rsqrt %12 : vector<8x1xf32>
    %14 = vector.broadcast %13 : vector<8x1xf32> to vector<8x128xf32>
    %15 = arith.mulf %3, %14 : vector<8x128xf32>
    %16 = vector.broadcast %5 : vector<1x128xf32> to vector<8x128xf32>
    %17 = arith.mulf %15, %16 : vector<8x128xf32>
    %18 = arith.truncf %17 : vector<8x128xf32> to vector<8x128xbf16>
    %c0_7 = arith.constant 0 : index
    %c0_8 = arith.constant 0 : index
    %c0_9 = arith.constant 0 : index
    %19 = vector.load %arg7[%c0_7, %c0_8, %c0_9] : memref<1x128x128xbf16, #tpu.memory_space<vmem>>, vector<1x128x128xbf16>
    %20 = vector.shape_cast %19 : vector<1x128x128xbf16> to vector<128x128xbf16>
    %cst_10 = arith.constant dense<0.000000e+00> : vector<8x128xf32>
    %21 = tpu.matmul %18, %20, %cst_10 {dimension_numbers = #tpu.dot_dimension_numbers<[1], [0], [0], [1], [0, 0, 1, 1], [], []>} : vector<8x128xbf16>, vector<128x128xbf16>, vector<8x128xf32> -> vector<8x128xf32>
    %c0_11 = arith.constant 0 : index
    %c0_12 = arith.constant 0 : index
    %c0_13 = arith.constant 0 : index
    %22 = vector.load %arg8[%c0_11, %c0_12, %c0_13] : memref<1x1x128xf32, #tpu.memory_space<vmem>>, vector<1x1x128xf32>
    %23 = vector.shape_cast %22 : vector<1x1x128xf32> to vector<1x128xf32>
    %24 = vector.broadcast %23 : vector<1x128xf32> to vector<8x128xf32>
    %25 = arith.addf %21, %24 : vector<8x128xf32>
    %c0_14 = arith.constant 0 : index
    %c0_15 = arith.constant 0 : index
    %c0_16 = arith.constant 0 : index
    %26 = vector.load %arg9[%c0_14, %c0_15, %c0_16] : memref<1x128x128xbf16, #tpu.memory_space<vmem>>, vector<1x128x128xbf16>
    %27 = vector.shape_cast %26 : vector<1x128x128xbf16> to vector<128x128xbf16>
    %cst_17 = arith.constant dense<0.000000e+00> : vector<8x128xf32>
    %28 = tpu.matmul %18, %27, %cst_17 {dimension_numbers = #tpu.dot_dimension_numbers<[1], [0], [0], [1], [0, 0, 1, 1], [], []>} : vector<8x128xbf16>, vector<128x128xbf16>, vector<8x128xf32> -> vector<8x128xf32>
    %c0_18 = arith.constant 0 : index
    %c0_19 = arith.constant 0 : index
    %c0_20 = arith.constant 0 : index
    %29 = vector.load %arg10[%c0_18, %c0_19, %c0_20] : memref<1x1x128xf32, #tpu.memory_space<vmem>>, vector<1x1x128xf32>
    %30 = vector.shape_cast %29 : vector<1x1x128xf32> to vector<1x128xf32>
    %31 = vector.broadcast %30 : vector<1x128xf32> to vector<8x128xf32>
    %32 = arith.addf %28, %31 : vector<8x128xf32>
    %c0_21 = arith.constant 0 : index
    %c0_22 = arith.constant 0 : index
    %c0_23 = arith.constant 0 : index
    %33 = vector.load %arg11[%c0_21, %c0_22, %c0_23] : memref<1x128x128xbf16, #tpu.memory_space<vmem>>, vector<1x128x128xbf16>
    %34 = vector.shape_cast %33 : vector<1x128x128xbf16> to vector<128x128xbf16>
    %cst_24 = arith.constant dense<0.000000e+00> : vector<8x128xf32>
    %35 = tpu.matmul %18, %34, %cst_24 {dimension_numbers = #tpu.dot_dimension_numbers<[1], [0], [0], [1], [0, 0, 1, 1], [], []>} : vector<8x128xbf16>, vector<128x128xbf16>, vector<8x128xf32> -> vector<8x128xf32>
    %c0_25 = arith.constant 0 : index
    %c0_26 = arith.constant 0 : index
    %c0_27 = arith.constant 0 : index
    %36 = vector.load %arg12[%c0_25, %c0_26, %c0_27] : memref<1x1x128xf32, #tpu.memory_space<vmem>>, vector<1x1x128xf32>
    %37 = vector.shape_cast %36 : vector<1x1x128xf32> to vector<1x128xf32>
    %38 = vector.broadcast %37 : vector<1x128xf32> to vector<8x128xf32>
    %39 = arith.addf %35, %38 : vector<8x128xf32>
    %40 = arith.truncf %39 : vector<8x128xf32> to vector<8x128xbf16>
    %c0_28 = arith.constant 0 : index
    %c0_29 = arith.constant 0 : index
    %41 = vector.load %arg3[%c0_28, %c0_29] : memref<8x128xf32, #tpu.memory_space<vmem>>, vector<8x128xf32>
    %c0_30 = arith.constant 0 : index
    %c0_31 = arith.constant 0 : index
    %42 = vector.load %arg4[%c0_30, %c0_31] : memref<8x128xf32, #tpu.memory_space<vmem>>, vector<8x128xf32>
    %43 = arith.mulf %25, %41 : vector<8x128xf32>
    %c64_i32 = arith.constant 64 : i32
    %44 = tpu.dynamic_rotate %25 by %c64_i32 dim 1 : vector<8x128xf32>, i32 -> vector<8x128xf32>
    %45 = arith.mulf %44, %42 : vector<8x128xf32>
    %46 = arith.addf %43, %45 : vector<8x128xf32>
    %47 = arith.truncf %46 : vector<8x128xf32> to vector<8x128xbf16>
    %48 = arith.mulf %32, %41 : vector<8x128xf32>
    %c64_i32_32 = arith.constant 64 : i32
    %49 = tpu.dynamic_rotate %32 by %c64_i32_32 dim 1 : vector<8x128xf32>, i32 -> vector<8x128xf32>
    %50 = arith.mulf %49, %42 : vector<8x128xf32>
    %51 = arith.addf %48, %50 : vector<8x128xf32>
    %52 = arith.truncf %51 : vector<8x128xf32> to vector<8x128xbf16>
    %c0_33 = arith.constant 0 : index
    %c0_34 = arith.constant 0 : index
    %53 = vector.load %arg5[%c0_33, %c0_34] : memref<8x8xf32, #tpu.memory_space<vmem>>, vector<8x8xf32>
    %54 = vector.extract_strided_slice %47 {offsets = [0, 0], sizes = [8, 16], strides = [1, 1]} : vector<8x128xbf16> to vector<8x16xbf16>
    %55 = vector.extract_strided_slice %47 {offsets = [0, 64], sizes = [8, 16], strides = [1, 1]} : vector<8x128xbf16> to vector<8x16xbf16>
    %56 = vector.extract_strided_slice %52 {offsets = [0, 0], sizes = [8, 16], strides = [1, 1]} : vector<8x128xbf16> to vector<8x16xbf16>
    %57 = vector.extract_strided_slice %52 {offsets = [0, 64], sizes = [8, 16], strides = [1, 1]} : vector<8x128xbf16> to vector<8x16xbf16>
    %cst_35 = arith.constant dense<0.000000e+00> : vector<8x8xf32>
    %58 = tpu.matmul %54, %56, %cst_35 {dimension_numbers = #tpu.dot_dimension_numbers<[1], [1], [0], [0], [0, 0, 1, 0], [], []>} : vector<8x16xbf16>, vector<8x16xbf16>, vector<8x8xf32> -> vector<8x8xf32>
    %cst_36 = arith.constant dense<0.000000e+00> : vector<8x8xf32>
    %59 = tpu.matmul %55, %57, %cst_36 {dimension_numbers = #tpu.dot_dimension_numbers<[1], [1], [0], [0], [0, 0, 1, 0], [], []>} : vector<8x16xbf16>, vector<8x16xbf16>, vector<8x8xf32> -> vector<8x8xf32>
    %60 = arith.addf %58, %59 : vector<8x8xf32>
    %cst_37 = arith.constant 0.176776692 : f32
    %61 = vector.broadcast %cst_37 : f32 to vector<8x8xf32>
    %62 = arith.mulf %60, %61 : vector<8x8xf32>
    %63 = arith.addf %62, %53 : vector<8x8xf32>
    %cst_38 = arith.constant dense<0xFF800000> : vector<8xf32>
    %64 = vector.multi_reduction <maximumf>, %63, %cst_38 [1] : vector<8x8xf32> to vector<8xf32>
    %65 = vector.shape_cast %64 : vector<8xf32> to vector<8x1xf32>
    %66 = vector.broadcast %65 : vector<8x1xf32> to vector<8x8xf32>
    %67 = arith.subf %63, %66 : vector<8x8xf32>
    %68 = math.exp %67 : vector<8x8xf32>
    %cst_39 = arith.constant dense<0.000000e+00> : vector<8xf32>
    %69 = vector.multi_reduction <add>, %68, %cst_39 [1] : vector<8x8xf32> to vector<8xf32>
    %70 = vector.shape_cast %69 : vector<8xf32> to vector<8x1xf32>
    %71 = tpu.reciprocal %70 {approx = true} : vector<8x1xf32> -> vector<8x1xf32>
    %72 = vector.broadcast %71 : vector<8x1xf32> to vector<8x8xf32>
    %73 = arith.mulf %68, %72 : vector<8x8xf32>
    %74 = vector.extract_strided_slice %40 {offsets = [0, 0], sizes = [8, 32], strides = [1, 1]} : vector<8x128xbf16> to vector<8x32xbf16>
    %75 = arith.truncf %73 : vector<8x8xf32> to vector<8x8xbf16>
    %cst_40 = arith.constant dense<0.000000e+00> : vector<8x32xf32>
    %76 = tpu.matmul %75, %74, %cst_40 {dimension_numbers = #tpu.dot_dimension_numbers<[1], [0], [0], [1], [0, 0, 1, 1], [], []>} : vector<8x8xbf16>, vector<8x32xbf16>, vector<8x32xf32> -> vector<8x32xf32>
    %77 = arith.truncf %76 : vector<8x32xf32> to vector<8x32xbf16>
    %c0_41 = arith.constant 0 : index
    %c0_42 = arith.constant 0 : index
    %78 = vector.load %arg22[%c0_41, %c0_42] : memref<8x128xbf16, #tpu.memory_space<vmem>>, vector<8x32xbf16>
    tpu.vector_store %arg22[%c0_41, %c0_42], %77 {strides = array<i32>} : memref<8x128xbf16, #tpu.memory_space<vmem>>, vector<8x32xbf16>,
    %79 = vector.extract_strided_slice %47 {offsets = [0, 16], sizes = [8, 16], strides = [1, 1]} : vector<8x128xbf16> to vector<8x16xbf16>
    %80 = vector.extract_strided_slice %47 {offsets = [0, 80], sizes = [8, 16], strides = [1, 1]} : vector<8x128xbf16> to vector<8x16xbf16>
    %81 = vector.extract_strided_slice %52 {offsets = [0, 16], sizes = [8, 16], strides = [1, 1]} : vector<8x128xbf16> to vector<8x16xbf16>
    %82 = vector.extract_strided_slice %52 {offsets = [0, 80], sizes = [8, 16], strides = [1, 1]} : vector<8x128xbf16> to vector<8x16xbf16>
    %cst_43 = arith.constant dense<0.000000e+00> : vector<8x8xf32>
    %83 = tpu.matmul %79, %81, %cst_43 {dimension_numbers = #tpu.dot_dimension_numbers<[1], [1], [0], [0], [0, 0, 1, 0], [], []>} : vector<8x16xbf16>, vector<8x16xbf16>, vector<8x8xf32> -> vector<8x8xf32>
    %cst_44 = arith.constant dense<0.000000e+00> : vector<8x8xf32>
    %84 = tpu.matmul %80, %82, %cst_44 {dimension_numbers = #tpu.dot_dimension_numbers<[1], [1], [0], [0], [0, 0, 1, 0], [], []>} : vector<8x16xbf16>, vector<8x16xbf16>, vector<8x8xf32> -> vector<8x8xf32>
    %85 = arith.addf %83, %84 : vector<8x8xf32>
    %cst_45 = arith.constant 0.176776692 : f32
    %86 = vector.broadcast %cst_45 : f32 to vector<8x8xf32>
    %87 = arith.mulf %85, %86 : vector<8x8xf32>
    %88 = arith.addf %87, %53 : vector<8x8xf32>
    %cst_46 = arith.constant dense<0xFF800000> : vector<8xf32>
    %89 = vector.multi_reduction <maximumf>, %88, %cst_46 [1] : vector<8x8xf32> to vector<8xf32>
    %90 = vector.shape_cast %89 : vector<8xf32> to vector<8x1xf32>
    %91 = vector.broadcast %90 : vector<8x1xf32> to vector<8x8xf32>
    %92 = arith.subf %88, %91 : vector<8x8xf32>
    %93 = math.exp %92 : vector<8x8xf32>
    %cst_47 = arith.constant dense<0.000000e+00> : vector<8xf32>
    %94 = vector.multi_reduction <add>, %93, %cst_47 [1] : vector<8x8xf32> to vector<8xf32>
    %95 = vector.shape_cast %94 : vector<8xf32> to vector<8x1xf32>
    %96 = tpu.reciprocal %95 {approx = true} : vector<8x1xf32> -> vector<8x1xf32>
    %97 = vector.broadcast %96 : vector<8x1xf32> to vector<8x8xf32>
    %98 = arith.mulf %93, %97 : vector<8x8xf32>
    %99 = vector.extract_strided_slice %40 {offsets = [0, 32], sizes = [8, 32], strides = [1, 1]} : vector<8x128xbf16> to vector<8x32xbf16>
    %100 = arith.truncf %98 : vector<8x8xf32> to vector<8x8xbf16>
    %cst_48 = arith.constant dense<0.000000e+00> : vector<8x32xf32>
    %101 = tpu.matmul %100, %99, %cst_48 {dimension_numbers = #tpu.dot_dimension_numbers<[1], [0], [0], [1], [0, 0, 1, 1], [], []>} : vector<8x8xbf16>, vector<8x32xbf16>, vector<8x32xf32> -> vector<8x32xf32>
    %102 = arith.truncf %101 : vector<8x32xf32> to vector<8x32xbf16>
    %c0_49 = arith.constant 0 : index
    %c32 = arith.constant 32 : index
    %103 = vector.load %arg22[%c0_49, %c32] : memref<8x128xbf16, #tpu.memory_space<vmem>>, vector<8x32xbf16>
    tpu.vector_store %arg22[%c0_49, %c32], %102 {strides = array<i32>} : memref<8x128xbf16, #tpu.memory_space<vmem>>, vector<8x32xbf16>,
    %104 = vector.extract_strided_slice %47 {offsets = [0, 32], sizes = [8, 16], strides = [1, 1]} : vector<8x128xbf16> to vector<8x16xbf16>
    %105 = vector.extract_strided_slice %47 {offsets = [0, 96], sizes = [8, 16], strides = [1, 1]} : vector<8x128xbf16> to vector<8x16xbf16>
    %106 = vector.extract_strided_slice %52 {offsets = [0, 32], sizes = [8, 16], strides = [1, 1]} : vector<8x128xbf16> to vector<8x16xbf16>
    %107 = vector.extract_strided_slice %52 {offsets = [0, 96], sizes = [8, 16], strides = [1, 1]} : vector<8x128xbf16> to vector<8x16xbf16>
    %cst_50 = arith.constant dense<0.000000e+00> : vector<8x8xf32>
    %108 = tpu.matmul %104, %106, %cst_50 {dimension_numbers = #tpu.dot_dimension_numbers<[1], [1], [0], [0], [0, 0, 1, 0], [], []>} : vector<8x16xbf16>, vector<8x16xbf16>, vector<8x8xf32> -> vector<8x8xf32>
    %cst_51 = arith.constant dense<0.000000e+00> : vector<8x8xf32>
    %109 = tpu.matmul %105, %107, %cst_51 {dimension_numbers = #tpu.dot_dimension_numbers<[1], [1], [0], [0], [0, 0, 1, 0], [], []>} : vector<8x16xbf16>, vector<8x16xbf16>, vector<8x8xf32> -> vector<8x8xf32>
    %110 = arith.addf %108, %109 : vector<8x8xf32>
    %cst_52 = arith.constant 0.176776692 : f32
    %111 = vector.broadcast %cst_52 : f32 to vector<8x8xf32>
    %112 = arith.mulf %110, %111 : vector<8x8xf32>
    %113 = arith.addf %112, %53 : vector<8x8xf32>
    %cst_53 = arith.constant dense<0xFF800000> : vector<8xf32>
    %114 = vector.multi_reduction <maximumf>, %113, %cst_53 [1] : vector<8x8xf32> to vector<8xf32>
    %115 = vector.shape_cast %114 : vector<8xf32> to vector<8x1xf32>
    %116 = vector.broadcast %115 : vector<8x1xf32> to vector<8x8xf32>
    %117 = arith.subf %113, %116 : vector<8x8xf32>
    %118 = math.exp %117 : vector<8x8xf32>
    %cst_54 = arith.constant dense<0.000000e+00> : vector<8xf32>
    %119 = vector.multi_reduction <add>, %118, %cst_54 [1] : vector<8x8xf32> to vector<8xf32>
    %120 = vector.shape_cast %119 : vector<8xf32> to vector<8x1xf32>
    %121 = tpu.reciprocal %120 {approx = true} : vector<8x1xf32> -> vector<8x1xf32>
    %122 = vector.broadcast %121 : vector<8x1xf32> to vector<8x8xf32>
    %123 = arith.mulf %118, %122 : vector<8x8xf32>
    %124 = vector.extract_strided_slice %40 {offsets = [0, 64], sizes = [8, 32], strides = [1, 1]} : vector<8x128xbf16> to vector<8x32xbf16>
    %125 = arith.truncf %123 : vector<8x8xf32> to vector<8x8xbf16>
    %cst_55 = arith.constant dense<0.000000e+00> : vector<8x32xf32>
    %126 = tpu.matmul %125, %124, %cst_55 {dimension_numbers = #tpu.dot_dimension_numbers<[1], [0], [0], [1], [0, 0, 1, 1], [], []>} : vector<8x8xbf16>, vector<8x32xbf16>, vector<8x32xf32> -> vector<8x32xf32>
    %127 = arith.truncf %126 : vector<8x32xf32> to vector<8x32xbf16>
    %c0_56 = arith.constant 0 : index
    %c64 = arith.constant 64 : index
    %128 = vector.load %arg22[%c0_56, %c64] : memref<8x128xbf16, #tpu.memory_space<vmem>>, vector<8x32xbf16>
    tpu.vector_store %arg22[%c0_56, %c64], %127 {strides = array<i32>} : memref<8x128xbf16, #tpu.memory_space<vmem>>, vector<8x32xbf16>,
    %129 = vector.extract_strided_slice %47 {offsets = [0, 48], sizes = [8, 16], strides = [1, 1]} : vector<8x128xbf16> to vector<8x16xbf16>
    %130 = vector.extract_strided_slice %47 {offsets = [0, 112], sizes = [8, 16], strides = [1, 1]} : vector<8x128xbf16> to vector<8x16xbf16>
    %131 = vector.extract_strided_slice %52 {offsets = [0, 48], sizes = [8, 16], strides = [1, 1]} : vector<8x128xbf16> to vector<8x16xbf16>
    %132 = vector.extract_strided_slice %52 {offsets = [0, 112], sizes = [8, 16], strides = [1, 1]} : vector<8x128xbf16> to vector<8x16xbf16>
    %cst_57 = arith.constant dense<0.000000e+00> : vector<8x8xf32>
    %133 = tpu.matmul %129, %131, %cst_57 {dimension_numbers = #tpu.dot_dimension_numbers<[1], [1], [0], [0], [0, 0, 1, 0], [], []>} : vector<8x16xbf16>, vector<8x16xbf16>, vector<8x8xf32> -> vector<8x8xf32>
    %cst_58 = arith.constant dense<0.000000e+00> : vector<8x8xf32>
    %134 = tpu.matmul %130, %132, %cst_58 {dimension_numbers = #tpu.dot_dimension_numbers<[1], [1], [0], [0], [0, 0, 1, 0], [], []>} : vector<8x16xbf16>, vector<8x16xbf16>, vector<8x8xf32> -> vector<8x8xf32>
    %135 = arith.addf %133, %134 : vector<8x8xf32>
    %cst_59 = arith.constant 0.176776692 : f32
    %136 = vector.broadcast %cst_59 : f32 to vector<8x8xf32>
    %137 = arith.mulf %135, %136 : vector<8x8xf32>
    %138 = arith.addf %137, %53 : vector<8x8xf32>
    %cst_60 = arith.constant dense<0xFF800000> : vector<8xf32>
    %139 = vector.multi_reduction <maximumf>, %138, %cst_60 [1] : vector<8x8xf32> to vector<8xf32>
    %140 = vector.shape_cast %139 : vector<8xf32> to vector<8x1xf32>
    %141 = vector.broadcast %140 : vector<8x1xf32> to vector<8x8xf32>
    %142 = arith.subf %138, %141 : vector<8x8xf32>
    %143 = math.exp %142 : vector<8x8xf32>
    %cst_61 = arith.constant dense<0.000000e+00> : vector<8xf32>
    %144 = vector.multi_reduction <add>, %143, %cst_61 [1] : vector<8x8xf32> to vector<8xf32>
    %145 = vector.shape_cast %144 : vector<8xf32> to vector<8x1xf32>
    %146 = tpu.reciprocal %145 {approx = true} : vector<8x1xf32> -> vector<8x1xf32>
    %147 = vector.broadcast %146 : vector<8x1xf32> to vector<8x8xf32>
    %148 = arith.mulf %143, %147 : vector<8x8xf32>
    %149 = vector.extract_strided_slice %40 {offsets = [0, 96], sizes = [8, 32], strides = [1, 1]} : vector<8x128xbf16> to vector<8x32xbf16>
    %150 = arith.truncf %148 : vector<8x8xf32> to vector<8x8xbf16>
    %cst_62 = arith.constant dense<0.000000e+00> : vector<8x32xf32>
    %151 = tpu.matmul %150, %149, %cst_62 {dimension_numbers = #tpu.dot_dimension_numbers<[1], [0], [0], [1], [0, 0, 1, 1], [], []>} : vector<8x8xbf16>, vector<8x32xbf16>, vector<8x32xf32> -> vector<8x32xf32>
    %152 = arith.truncf %151 : vector<8x32xf32> to vector<8x32xbf16>
    %c0_63 = arith.constant 0 : index
    %c96 = arith.constant 96 : index
    %153 = vector.load %arg22[%c0_63, %c96] : memref<8x128xbf16, #tpu.memory_space<vmem>>, vector<8x32xbf16>
    tpu.vector_store %arg22[%c0_63, %c96], %152 {strides = array<i32>} : memref<8x128xbf16, #tpu.memory_space<vmem>>, vector<8x32xbf16>,
    %c0_64 = arith.constant 0 : index
    %c0_65 = arith.constant 0 : index
    %154 = vector.load %arg22[%c0_64, %c0_65] : memref<8x128xbf16, #tpu.memory_space<vmem>>, vector<8x128xbf16>
    %c0_66 = arith.constant 0 : index
    %c0_67 = arith.constant 0 : index
    %c0_68 = arith.constant 0 : index
    %155 = vector.load %arg13[%c0_66, %c0_67, %c0_68] : memref<1x128x128xbf16, #tpu.memory_space<vmem>>, vector<1x128x128xbf16>
    %156 = vector.shape_cast %155 : vector<1x128x128xbf16> to vector<128x128xbf16>
    %cst_69 = arith.constant dense<0.000000e+00> : vector<8x128xf32>
    %157 = tpu.matmul %154, %156, %cst_69 {dimension_numbers = #tpu.dot_dimension_numbers<[1], [0], [0], [1], [0, 0, 1, 1], [], []>} : vector<8x128xbf16>, vector<128x128xbf16>, vector<8x128xf32> -> vector<8x128xf32>
    %c0_70 = arith.constant 0 : index
    %c0_71 = arith.constant 0 : index
    %c0_72 = arith.constant 0 : index
    %158 = vector.load %arg14[%c0_70, %c0_71, %c0_72] : memref<1x1x128xf32, #tpu.memory_space<vmem>>, vector<1x1x128xf32>
    %159 = vector.shape_cast %158 : vector<1x1x128xf32> to vector<1x128xf32>
    %160 = vector.broadcast %159 : vector<1x128xf32> to vector<8x128xf32>
    %161 = arith.addf %157, %160 : vector<8x128xf32>
    %162 = arith.addf %3, %161 : vector<8x128xf32>
    %c0_73 = arith.constant 0 : index
    %c0_74 = arith.constant 0 : index
    %c0_75 = arith.constant 0 : index
    %163 = vector.load %arg15[%c0_73, %c0_74, %c0_75] : memref<1x1x128xf32, #tpu.memory_space<vmem>>, vector<1x1x128xf32>
    %164 = vector.shape_cast %163 : vector<1x1x128xf32> to vector<1x128xf32>
    %165 = arith.mulf %162, %162 : vector<8x128xf32>
    %cst_76 = arith.constant dense<0.000000e+00> : vector<8xf32>
    %166 = vector.multi_reduction <add>, %165, %cst_76 [1] : vector<8x128xf32> to vector<8xf32>
    %167 = vector.shape_cast %166 : vector<8xf32> to vector<8x1xf32>
    %cst_77 = arith.constant 1.280000e+02 : f32
    %168 = vector.broadcast %cst_77 : f32 to vector<8x1xf32>
    %169 = arith.divf %167, %168 : vector<8x1xf32>
    %cst_78 = arith.constant 9.99999997E-7 : f32
    %170 = vector.broadcast %cst_78 : f32 to vector<8x1xf32>
    %171 = arith.addf %169, %170 : vector<8x1xf32>
    %172 = math.rsqrt %171 : vector<8x1xf32>
    %173 = vector.broadcast %172 : vector<8x1xf32> to vector<8x128xf32>
    %174 = arith.mulf %162, %173 : vector<8x128xf32>
    %175 = vector.broadcast %164 : vector<1x128xf32> to vector<8x128xf32>
    %176 = arith.mulf %174, %175 : vector<8x128xf32>
    %177 = arith.truncf %176 : vector<8x128xf32> to vector<8x128xbf16>
    %c0_79 = arith.constant 0 : index
    %c0_80 = arith.constant 0 : index
    %c0_81 = arith.constant 0 : index
    %178 = vector.load %arg16[%c0_79, %c0_80, %c0_81] : memref<1x128x512xbf16, #tpu.memory_space<vmem>>, vector<1x128x512xbf16>
    %179 = vector.shape_cast %178 : vector<1x128x512xbf16> to vector<128x512xbf16>
    %cst_82 = arith.constant dense<0.000000e+00> : vector<8x512xf32>
    %180 = tpu.matmul %177, %179, %cst_82 {dimension_numbers = #tpu.dot_dimension_numbers<[1], [0], [0], [1], [0, 0, 1, 1], [], []>} : vector<8x128xbf16>, vector<128x512xbf16>, vector<8x512xf32> -> vector<8x512xf32>
    %c0_83 = arith.constant 0 : index
    %c0_84 = arith.constant 0 : index
    %c0_85 = arith.constant 0 : index
    %181 = vector.load %arg17[%c0_83, %c0_84, %c0_85] : memref<1x1x512xf32, #tpu.memory_space<vmem>>, vector<1x1x512xf32>
    %182 = vector.shape_cast %181 : vector<1x1x512xf32> to vector<1x512xf32>
    %183 = vector.broadcast %182 : vector<1x512xf32> to vector<8x512xf32>
    %184 = arith.addf %180, %183 : vector<8x512xf32>
    %185 = arith.negf %184 : vector<8x512xf32>
    %186 = math.exp %185 : vector<8x512xf32>
    %cst_86 = arith.constant 1.000000e+00 : f32
    %187 = vector.broadcast %cst_86 : f32 to vector<8x512xf32>
    %188 = arith.addf %187, %186 : vector<8x512xf32>
    %189 = arith.divf %187, %188 : vector<8x512xf32>
    %190 = arith.mulf %184, %189 : vector<8x512xf32>
    %191 = arith.truncf %190 : vector<8x512xf32> to vector<8x512xbf16>
    %c0_87 = arith.constant 0 : index
    %c0_88 = arith.constant 0 : index
    %c0_89 = arith.constant 0 : index
    %192 = vector.load %arg18[%c0_87, %c0_88, %c0_89] : memref<1x512x128xbf16, #tpu.memory_space<vmem>>, vector<1x512x128xbf16>
    %193 = vector.shape_cast %192 : vector<1x512x128xbf16> to vector<512x128xbf16>
    %cst_90 = arith.constant dense<0.000000e+00> : vector<8x128xf32>
    %194 = tpu.matmul %191, %193, %cst_90 {dimension_numbers = #tpu.dot_dimension_numbers<[1], [0], [0], [1], [0, 0, 1, 1], [], []>} : vector<8x512xbf16>, vector<512x128xbf16>, vector<8x128xf32> -> vector<8x128xf32>
    %c0_91 = arith.constant 0 : index
    %c0_92 = arith.constant 0 : index
    %c0_93 = arith.constant 0 : index
    %195 = vector.load %arg19[%c0_91, %c0_92, %c0_93] : memref<1x1x128xf32, #tpu.memory_space<vmem>>, vector<1x1x128xf32>
    %196 = vector.shape_cast %195 : vector<1x1x128xf32> to vector<1x128xf32>
    %197 = vector.broadcast %196 : vector<1x128xf32> to vector<8x128xf32>
    %198 = arith.addf %194, %197 : vector<8x128xf32>
    %199 = arith.addf %162, %198 : vector<8x128xf32>
    %c0_94 = arith.constant 0 : index
    %c0_95 = arith.constant 0 : index
    %200 = vector.load %arg21[%c0_94, %c0_95] : memref<8x128xf32, #tpu.memory_space<vmem>>, vector<8x128xf32>
    tpu.vector_store %arg21[%c0_94, %c0_95], %199 {strides = array<i32>} : memref<8x128xf32, #tpu.memory_space<vmem>>, vector<8x128xf32>,
    %c1_i32 = arith.constant 1 : i32
    %201 = arith.cmpi eq, %arg1, %c1_i32 : i32
    %202 = arith.extui %201 : i1 to i32
    %c0_i32_96 = arith.constant 0 : i32
    %203 = arith.cmpi ne, %202, %c0_i32_96 : i32
    scf.if %203 {
      %c0_97 = arith.constant 0 : index
      %c0_98 = arith.constant 0 : index
      %c0_99 = arith.constant 0 : index
      %204 = vector.load %arg20[%c0_97, %c0_98, %c0_99] : memref<1x8x128xf32, #tpu.memory_space<vmem>>, vector<1x8x128xf32>
      %205 = vector.shape_cast %204 : vector<1x8x128xf32> to vector<8x128xf32>
      %206 = vector.shape_cast %199 : vector<8x128xf32> to vector<1x8x128xf32>
      tpu.vector_store %arg20[%c0_97, %c0_98, %c0_99], %206 {strides = array<i32>} : memref<1x8x128xf32, #tpu.memory_space<vmem>>, vector<1x8x128xf32>,
    } else {
    }
    return
  }
  func.func @transform_0(%arg0: i32, %arg1: i32) -> (i32, i32, i32) {
    %c0_i32 = arith.constant 0 : i32
    %c0_i32_0 = arith.constant 0 : i32
    %c0_i32_1 = arith.constant 0 : i32
    return %arg0, %c0_i32, %c0_i32_0 : i32, i32, i32
  }
  func.func @transform_1(%arg0: i32, %arg1: i32) -> (i32, i32) {
    %c0_i32 = arith.constant 0 : i32
    %c0_i32_0 = arith.constant 0 : i32
    %c0_i32_1 = arith.constant 0 : i32
    return %c0_i32, %c0_i32_0 : i32, i32
  }
  func.func @transform_2(%arg0: i32, %arg1: i32) -> (i32, i32) {
    %c0_i32 = arith.constant 0 : i32
    %c0_i32_0 = arith.constant 0 : i32
    %c0_i32_1 = arith.constant 0 : i32
    return %c0_i32, %c0_i32_0 : i32, i32
  }
  func.func @transform_3(%arg0: i32, %arg1: i32) -> (i32, i32) {
    %c0_i32 = arith.constant 0 : i32
    %c0_i32_0 = arith.constant 0 : i32
    %c0_i32_1 = arith.constant 0 : i32
    return %c0_i32, %c0_i32_0 : i32, i32
  }
  func.func @transform_4(%arg0: i32, %arg1: i32) -> (i32, i32, i32) {
    %c0_i32 = arith.constant 0 : i32
    %c0_i32_0 = arith.constant 0 : i32
    %c0_i32_1 = arith.constant 0 : i32
    return %arg1, %c0_i32, %c0_i32_0 : i32, i32, i32
  }
  func.func @transform_5(%arg0: i32, %arg1: i32) -> (i32, i32, i32) {
    %c0_i32 = arith.constant 0 : i32
    %c0_i32_0 = arith.constant 0 : i32
    %c0_i32_1 = arith.constant 0 : i32
    return %arg1, %c0_i32, %c0_i32_0 : i32, i32, i32
  }
  func.func @transform_6(%arg0: i32, %arg1: i32) -> (i32, i32, i32) {
    %c0_i32 = arith.constant 0 : i32
    %c0_i32_0 = arith.constant 0 : i32
    %c0_i32_1 = arith.constant 0 : i32
    return %arg1, %c0_i32, %c0_i32_0 : i32, i32, i32
  }
  func.func @transform_7(%arg0: i32, %arg1: i32) -> (i32, i32, i32) {
    %c0_i32 = arith.constant 0 : i32
    %c0_i32_0 = arith.constant 0 : i32
    %c0_i32_1 = arith.constant 0 : i32
    return %arg1, %c0_i32, %c0_i32_0 : i32, i32, i32
  }
  func.func @transform_8(%arg0: i32, %arg1: i32) -> (i32, i32, i32) {
    %c0_i32 = arith.constant 0 : i32
    %c0_i32_0 = arith.constant 0 : i32
    %c0_i32_1 = arith.constant 0 : i32
    return %arg1, %c0_i32, %c0_i32_0 : i32, i32, i32
  }
  func.func @transform_9(%arg0: i32, %arg1: i32) -> (i32, i32, i32) {
    %c0_i32 = arith.constant 0 : i32
    %c0_i32_0 = arith.constant 0 : i32
    %c0_i32_1 = arith.constant 0 : i32
    return %arg1, %c0_i32, %c0_i32_0 : i32, i32, i32
  }
  func.func @transform_10(%arg0: i32, %arg1: i32) -> (i32, i32, i32) {
    %c0_i32 = arith.constant 0 : i32
    %c0_i32_0 = arith.constant 0 : i32
    %c0_i32_1 = arith.constant 0 : i32
    return %arg1, %c0_i32, %c0_i32_0 : i32, i32, i32
  }
  func.func @transform_11(%arg0: i32, %arg1: i32) -> (i32, i32, i32) {
    %c0_i32 = arith.constant 0 : i32
    %c0_i32_0 = arith.constant 0 : i32
    %c0_i32_1 = arith.constant 0 : i32
    return %arg1, %c0_i32, %c0_i32_0 : i32, i32, i32
  }
  func.func @transform_12(%arg0: i32, %arg1: i32) -> (i32, i32, i32) {
    %c0_i32 = arith.constant 0 : i32
    %c0_i32_0 = arith.constant 0 : i32
    %c0_i32_1 = arith.constant 0 : i32
    return %arg1, %c0_i32, %c0_i32_0 : i32, i32, i32
  }
  func.func @transform_13(%arg0: i32, %arg1: i32) -> (i32, i32, i32) {
    %c0_i32 = arith.constant 0 : i32
    %c0_i32_0 = arith.constant 0 : i32
    %c0_i32_1 = arith.constant 0 : i32
    return %arg1, %c0_i32, %c0_i32_0 : i32, i32, i32
  }
  func.func @transform_14(%arg0: i32, %arg1: i32) -> (i32, i32, i32) {
    %c0_i32 = arith.constant 0 : i32
    %c0_i32_0 = arith.constant 0 : i32
    %c0_i32_1 = arith.constant 0 : i32
    return %arg1, %c0_i32, %c0_i32_0 : i32, i32, i32
  }
  func.func @transform_15(%arg0: i32, %arg1: i32) -> (i32, i32, i32) {
    %c0_i32 = arith.constant 0 : i32
    %c0_i32_0 = arith.constant 0 : i32
    %c0_i32_1 = arith.constant 0 : i32
    return %arg1, %c0_i32, %c0_i32_0 : i32, i32, i32
  }
  func.func @transform_16(%arg0: i32, %arg1: i32) -> (i32, i32, i32) {
    %c0_i32 = arith.constant 0 : i32
    %c0_i32_0 = arith.constant 0 : i32
    %c0_i32_1 = arith.constant 0 : i32
    return %arg1, %c0_i32, %c0_i32_0 : i32, i32, i32
  }
  func.func @transform_17(%arg0: i32, %arg1: i32) -> (i32, i32, i32) {
    %c0_i32 = arith.constant 0 : i32
    %c0_i32_0 = arith.constant 0 : i32
    %c0_i32_1 = arith.constant 0 : i32
    return %arg1, %c0_i32, %c0_i32_0 : i32, i32, i32
  }
  func.func @transform_18(%arg0: i32, %arg1: i32) -> (i32, i32, i32) {
    %c0_i32 = arith.constant 0 : i32
    %c0_i32_0 = arith.constant 0 : i32
    %c0_i32_1 = arith.constant 0 : i32
    return %arg0, %c0_i32, %c0_i32_0 : i32, i32, i32
  }
}

</mosaic_0001>

<bundles_post_ra>
// kernel: tpu_custom_call.1
= control target key start
LH: loop header
LB: loop body
LE: loop exit
PB: predicated region body
PF: predicated region fallthrough
CT: control target
= control target key end

     0   :  { %s5359_s0 = inlined_call_operand.hbm [shape: f32[2,8,128], index: 0, kind: input, shape index: {}]   ;;  %s5360_s1 = inlined_call_operand.hbm [shape: f32[8,128], index: 1, kind: input, shape index: {}]   ;;  %s5361_s2 = inlined_call_operand.hbm [shape: f32[8,128], index: 2, kind: input, shape index: {}]   ;;  %s5362_s3 = inlined_call_operand.vmem [shape: f32[8,8], index: 3, kind: input, shape index: {}]   ;;  %s5363_s4 = inlined_call_operand.vmem [shape: f32[2,1,128], index: 4, kind: input, shape index: {}]   ;;  %s5364_s5 = inlined_call_operand.hbm [shape: bf16[2,128,128], index: 5, kind: input, shape index: {}]   ;;  %s5365_s6 = inlined_call_operand.vmem [shape: f32[2,1,128], index: 6, kind: input, shape index: {}]   ;;  %s5366_s7 = inlined_call_operand.hbm [shape: bf16[2,128,128], index: 7, kind: input, shape index: {}]   ;;  %s5367_s8 = inlined_call_operand.vmem [shape: f32[2,1,128], index: 8, kind: input, shape index: {}]   ;;  %s5368_s9 = inlined_call_operand.hbm [shape: bf16[2,128,128], index: 9, kind: input, shape index: {}]   ;;  %s5369_s10 = inlined_call_operand.vmem [shape: f32[2,1,128], index: 10, kind: input, shape index: {}]   ;;  %s5370_s11 = inlined_call_operand.hbm [shape: bf16[2,128,128], index: 11, kind: input, shape index: {}]   ;;  %s5371_s12 = inlined_call_operand.vmem [shape: f32[2,1,128], index: 12, kind: input, shape index: {}]   ;;  %s5372_s13 = inlined_call_operand.vmem [shape: f32[2,1,128], index: 13, kind: input, shape index: {}]   ;;  %s5373_s14 = inlined_call_operand.hbm [shape: bf16[2,128,512], index: 14, kind: input, shape index: {}]   ;;  %s5374_s15 = inlined_call_operand.vmem [shape: f32[2,1,512], index: 15, kind: input, shape index: {}]   ;;  %s5375_s16 = inlined_call_operand.hbm [shape: bf16[2,512,128], index: 16, kind: input, shape index: {}]   ;;  %s5376_s17 = inlined_call_operand.vmem [shape: f32[2,1,128], index: 17, kind: input, shape index: {}]   ;;  %s5377_s18 = inlined_call_operand.hbm [shape: f32[2,8,128], index: 18, kind: output, shape index: {}]  }
   0x1   :  { %5437 = sst [smem:[#allocation49_spill]] %s5359_s0 }
   0x2   :  { %5438 = sst [smem:[#allocation50_spill]] %s5360_s1 }
   0x3   :  { %5439 = sst [smem:[#allocation51_spill]] %s5361_s2 }
   0x4   :  { %5440 = sst [smem:[#allocation52_spill]] %s5362_s3 }
   0x5   :  { %5441 = sst [smem:[#allocation53_spill]] %s5363_s4 }
   0x6   :  { %5442 = sst [smem:[#allocation54_spill]] %s5364_s5 }
   0x7   :  { %5443 = sst [smem:[#allocation55_spill]] %s5365_s6 }
   0x8   :  { %5444 = sst [smem:[#allocation56_spill]] %s5366_s7 }
   0x9   :  { %5445 = sst [smem:[#allocation57_spill]] %s5367_s8 }
   0xa   :  { %5446 = sst [smem:[#allocation58_spill]] %s5368_s9 }
   0xb   :  { %5447 = sst [smem:[#allocation59_spill]] %s5369_s10 }
   0xc   :  { %5448 = sst [smem:[#allocation60_spill]] %s5370_s11 }
   0xd   :  { %5449 = sst [smem:[#allocation61_spill]] %s5371_s12 }
   0xe   :  { %5450 = sst [smem:[#allocation62_spill]] %s5372_s13 }
   0xf   :  { %5451 = sst [smem:[#allocation63_spill]] %s5373_s14 }
  0x10   :  { %5452 = sst [smem:[#allocation64_spill]] %s5374_s15 }
  0x11   :  { %5453 = sst [smem:[#allocation65_spill]] %s5375_s16 }
  0x12   :  { %5454 = sst [smem:[#allocation66_spill]] %s5376_s17 }
  0x13   :  { %5455 = sst [smem:[#allocation67_spill]] %s5377_s18 }
  0x14   :  { %23 = vsyncpa [#allocation5], 0 }
  0x15   :  { %25 = vsyncpa [#allocation5 + $0x1], 0 }
  0x16   :  { %26 = vsyncpa [#allocation8], 0 }
  0x17   :  { %27 = vsyncpa [#allocation11], 0 }
  0x18   :  { %29 = vsyncpa [#allocation11 + $0x1], 0 }
  0x19   :  { %30 = vsyncpa [#allocation14], 0 }
  0x1a   :  { %32 = vsyncpa [#allocation14 + $0x1], 0 }
  0x1b   :  { %33 = vsyncpa [#allocation17], 0 }
  0x1c   :  { %35 = vsyncpa [#allocation17 + $0x1], 0 }
  0x1d   :  { %36 = vsyncpa [#allocation6], 0 }
  0x1e   :  { %38 = vsyncpa [#allocation6 + $0x1], 0  ;;  %s4436_s27 = smov 0   ;;  %s4438_s28 = smov 0  }
  0x1f   :  { %s4440_s29 = smov 0   ;;  %s4442_s30 = smov 0  }
  0x20   :  { %s4444_s0 = smov 0   ;;  %s4446_s19 = smov 0  }
  0x21   :  { %s4448_s1 = smov 0   ;;  %s4450_s20 = smov 0  }
  0x22   :  { %s4452_s21 = smov 0   ;;  %s4454_s22 = smov 0  }
  0x23   :  { %s4456_s2 = smov 0  }
  0x24 LB: > { %5456 = sst [smem:[#allocation26_spill]] %s4279_s28  ;;  %s4490_s23 = sadd.s32 4294967295, %s4315_s2   ;;  %s4315_s2 = sphi %s4456_s2, %s44_s2   ;;  %s4311_s22 = sphi %s4454_s22, %s5569_s22   ;;  %s4307_s21 = sphi %s4452_s21, %s5568_s21   ;;  %s4303_s20 = sphi %s4450_s20, %s5567_s20   ;;  %s4299_s1 = sphi %s4448_s1, %s5566_s1   ;;  %s4295_s19 = sphi %s4446_s19, %s5565_s19   ;;  %s4291_s0 = sphi %s4444_s0, %s5564_s0   ;;  %s4287_s30 = sphi %s4442_s30, %s5563_s30   ;;  %s4283_s29 = sphi %s4440_s29, %s5562_s29   ;;  %s4279_s28 = sphi %s4438_s28, %s5561_s28   ;;  %s4275_s27 = sphi %s4436_s27, %s5560_s27  }
  0x25   : > { %5457 = sst [smem:[#allocation27_spill]] %s4283_s29  ;;  %p5384_p0 = scmp.eq.s32.totalorder %s4315_s2, 0 }
  0x26   : > { %5458 = sst [smem:[#allocation28_spill]] %s4287_s30  ;;  %p5383_p1 = scmp.eq.s32.totalorder %s4490_s23, 0 }
  0x27   : > { %5459 = sst [smem:[#allocation29_spill]] %s4291_s0  ;;  %p185_p2 = scmp.ne.s32.totalorder %s4283_s29, %s4279_s28 }
  0x28   : > { %5460 = sst [smem:[#allocation30_spill]] %s4295_s19  ;;  %p191_p3 = scmp.ne.s32.totalorder %s4279_s28, %s4275_s27 }
  0x29   : > { %5461 = sst [smem:[#allocation31_spill]] %s4299_s1  ;;  %p3153_p4 = scmp.ge.s32.totalorder %s4315_s2, 1 }
  0x2a   : > { %5462 = sst [smem:[#allocation32_spill]] %s4303_s20  ;;  %p187_p5 = por %p185_p2, %p5384_p0 }
  0x2b   : > { %5463 = sst [smem:[#allocation33_spill]] %s4307_s21  ;;  %p4503_p6 = por %p191_p3, %p5383_p1 }
  0x2c   : > { %5464 = sst [smem:[#allocation34_spill]] %s4311_s22  ;;  %p540_p7 = scmp.lt.s32.totalorder %s4315_s2, 5 }
  0x2d   : > { %5465 = sst [smem:[#allocation35_spill]] %s4315_s2  ;;  %s4317_s18 = smov [#allocation7]  }
  0x2e   : > { %s5466_s25 = scalar_select %p4503_p6, 1, 0 }
  0x2f   : > { %p4508_p8 = pnand %p3153_p4, %p540_p7  ;;  %s553_s20 = sshll.u32 %s4317_s18, 4  ;;  %s554_s20 = int_to_ptr.vmem [resolvable:$true] %s553_s20 }
  0x30   : > { %5467 = sst [smem:[#allocation36_spill]] %s5466_s25  ;;  %p5382_p9 = scmp.lt.s32.totalorder %s4315_s2, 4 }
  0x31   : > { %s5468_s26 = scalar_select %p4508_p8, 1, 0 }
  0x32   : > { %p3619_p10 = pneg %p4508_p8  ;;  %p4517_p11 = pnand %p5382_p9, %p187_p5 }
  0x33   : > { %5469 = sst [smem:[#allocation37_spill]] %s5468_s26  ;;  %s4528_s3 = sand.u32 1, %s4315_s2  }
  0x34   : > { %s5470_s27 = scalar_select %p4517_p11, 1, 0 }
  0x35   : > { %p4523_p12 = pnand %p3619_p10, %p5383_p1  ;;  %5473 = sst [smem:[#allocation39_spill]] %s4528_s3 }
  0x36   : > { %5471 = sst [smem:[#allocation38_spill]] %s5470_s27  ;;  %s5474_s13 = sld [smem:[#allocation50_spill]] }
  0x37   : > { %s5472_s24 = scalar_select %p4523_p12, 1, 0 }
  0x38   : > { %p5392_p2 = pneg %p4523_p12 }
  0x3c   : > { %s3911_s12 = scalar_lea.hbm %s5474_s13, 128 }
  0x3d   : > { %p3912_p13 = scmp.ne.s32.totalorder %s5474_s13, %s3911_s12  ;;  %p3918_p5 = scmp.lt.u32.totalorder %s3911_s12, %s5474_s13 }
  0x3f   : > { %p3914_p3 = pnand %p5392_p2, %p3912_p13 }
  0x41   : > { %p3915_p4 = pneg %p3914_p3 }
  0x43   : > { %p3920_p7 = pnand %p3918_p5, %p3915_p4 }
  0x45   : > { %3923 = shalt.err (!%p3920_p7)
}
  0x46   : > { %s3924_s15 = scalar_lea.vmem %s554_s20, 128  ;;  %p3932_p0 = scmp.lt.s32.totalorder %s554_s20, %s554_s20 }
  0x47   : > { %p3925_p10 = scmp.ne.s32.totalorder %s554_s20, %s3924_s15  ;;  %p3933_p6 = scmp.lt.s32.totalorder %s3924_s15, %s3924_s15 }
  0x49   : > { %p3927_p9 = pnand %p3925_p10, %p5392_p2  ;;  %p3934_p8 = por %p3933_p6, %p3932_p0 }
  0x4b   : > { %p3928_p1 = pneg %p3927_p9 }
  0x4d   : > { %p3935_p11 = pnand %p3934_p8, %p3928_p1 }
  0x4f   : > { %3938 = shalt.err (!%p3935_p11)
}
  0x50   : > { %3622 = dma.hbm_to_vmem [thread:$0]  (!%p4523_p12), %s5474_s13, 128, %s554_s20, [#allocation8]  }
  0x51   : > { %s5475_s4 = sand.u32 1, %s4283_s29   ;;  %s4558_s12 = sshll.u32 %s4307_s21, 10 }
  0x52   : > { %s4555_s6 = sshll.u32 %s5475_s4, 6  ;;  %s5477_s5 = sld [smem:[#allocation54_spill]] }
  0x53   : > { %5476 = sst [smem:[#allocation40_spill]] %s4555_s6  ;;  %s606_s8 = scalar_lea.vmem [#allocation10], %s4555_s6 }
  0x54   : > { %s613_s10 = sshll.u32 %s606_s8, 4  ;;  %p5478_p1 = scmp.ne.s32.totalorder %s5470_s27, 0  ;;  %s4567_s10 = int_to_ptr.vmem [resolvable:$true] %s613_s10 }
  0x56   : > { %p4574_p6 = pneg %p5478_p1 }
  0x58   : > { %s4564_s18 = scalar_lea.hbm %s5477_s5, %s4558_s12  ;;  %s3944_s1 = scalar_lea.hbm %s5477_s5, 2048 }
  0x59   : > { %s3939_s4 = scalar_lea.hbm %s4564_s18, 1024  ;;  %p3945_p11 = scmp.lt.u32.totalorder %s4564_s18, %s5477_s5 }
  0x5a   : > { %p3940_p0 = scmp.ne.s32.totalorder %s4564_s18, %s3939_s4  ;;  %p3946_p13 = scmp.lt.u32.totalorder %s3944_s1, %s3939_s4 }
  0x5b   : > { %s5479_s13 = scalar_select %p4574_p6, 1, 0 }
  0x5c   : > { %p3942_p8 = pnand %p4574_p6, %p3940_p0  ;;  %p3947_p3 = por %p3946_p13, %p3945_p11 }
  0x5d   : > { %5480 = sst [smem:[#allocation41_spill]] %s5479_s13  ;;  %p3948_p4 = scmp.lt.u32.totalorder %s3939_s4, %s4564_s18 }
  0x5e   : > { %p3943_p9 = pneg %p3942_p8 }
  0x5f   : > { %p3949_p5 = por %p3948_p4, %p3947_p3 }
  0x61   : > { %p3950_p7 = pnand %p3949_p5, %p3943_p9 }
  0x63   : > { %3953 = shalt.err (!%p3950_p7)
}
  0x64   : > { %s3954_s20 = scalar_lea.vmem %s4567_s10, 1024  ;;  %s4318_s15 = smov [#allocation10]  }
  0x65   : > { %p3955_p10 = scmp.ne.s32.totalorder %s4567_s10, %s3954_s20  ;;  %s3959_s17 = sshll.u32 %s4318_s15, 4  ;;  %s3960_s17 = int_to_ptr.vmem [resolvable:$false] %s3959_s17 }
  0x66   : > { %s3961_s25 = scalar_lea.vmem %s3960_s17, 2048  ;;  %p3962_p2 = scmp.lt.s32.totalorder %s4567_s10, %s3960_s17 }
  0x67   : > { %p3957_p0 = pnand %p3955_p10, %p4574_p6  ;;  %p3963_p12 = scmp.lt.s32.totalorder %s3961_s25, %s3954_s20 }
  0x69   : > { %p3958_p8 = pneg %p3957_p0  ;;  %p3964_p11 = por %p3963_p12, %p3962_p2 }
  0x6b   : > { %p3965_p13 = pnand %p3964_p11, %p3958_p8 }
  0x6d   : > { %3968 = shalt.err (!%p3965_p13)
}
  0x6e   : > { %s5398_s1 = smov 64   ;;  %s5400_s4 = smov 4  }
  0x6f   : > { %s5481_s8 = scalar_lea.sflag [#allocation11], %s4528_s3  ;;  %s5482_s9 = sld [smem:[#allocation58_spill]] }
  0x70   : > { %3632 = dma.hbm_to_vmem [thread:$0]  (!%p5478_p1), %s4564_s18, 1024, %s4567_s10, %s5481_s8, %s5398_s1, %s5398_s1, %s5400_s4  }
  0x71   : > { %s660_s25 = scalar_lea.vmem [#allocation13], %s4555_s6  ;;  %s5397_s28 = scalar_lea.sflag [#allocation14], %s4528_s3 }
  0x72   : > { %s667_s5 = sshll.u32 %s660_s25, 4  ;;  %s4609_s5 = int_to_ptr.vmem [resolvable:$true] %s667_s5 }
  0x75   : > { %s4606_s17 = scalar_lea.hbm %s5482_s9, %s4558_s12  ;;  %s3974_s8 = scalar_lea.hbm %s5482_s9, 2048 }
  0x76   : > { %s3969_s26 = scalar_lea.hbm %s4606_s17, 1024  ;;  %p3975_p3 = scmp.lt.u32.totalorder %s4606_s17, %s5482_s9 }
  0x77   : > { %p3970_p12 = scmp.ne.s32.totalorder %s4606_s17, %s3969_s26  ;;  %p3976_p4 = scmp.lt.u32.totalorder %s3974_s8, %s3969_s26 }
  0x78   : > { %p3978_p7 = scmp.lt.u32.totalorder %s3969_s26, %s4606_s17 }
  0x79   : > { %p3972_p2 = pnand %p3970_p12, %p4574_p6  ;;  %p3977_p5 = por %p3976_p4, %p3975_p3 }
  0x7b   : > { %p3973_p9 = pneg %p3972_p2  ;;  %p3979_p10 = por %p3978_p7, %p3977_p5 }
  0x7d   : > { %p3980_p0 = pnand %p3979_p10, %p3973_p9 }
  0x7f   : > { %3983 = shalt.err (!%p3980_p0)
}
  0x80   : > { %s3984_s25 = scalar_lea.vmem %s4609_s5, 1024  ;;  %s4321_s18 = smov [#allocation13]  }
  0x81   : > { %p3985_p8 = scmp.ne.s32.totalorder %s4609_s5, %s3984_s25  ;;  %s3989_s10 = sshll.u32 %s4321_s18, 4  ;;  %s3990_s10 = int_to_ptr.vmem [resolvable:$false] %s3989_s10 }
  0x82   : > { %s3991_s20 = scalar_lea.vmem %s3990_s10, 2048  ;;  %p3992_p12 = scmp.lt.s32.totalorder %s4609_s5, %s3990_s10 }
  0x83   : > { %p3987_p11 = pnand %p3985_p8, %p4574_p6  ;;  %p3993_p2 = scmp.lt.s32.totalorder %s3991_s20, %s3984_s25 }
  0x85   : > { %p3988_p13 = pneg %p3987_p11  ;;  %p3994_p3 = por %p3993_p2, %p3992_p12 }
  0x87   : > { %p3995_p4 = pnand %p3994_p3, %p3988_p13 }
  0x89   : > { %3998 = shalt.err (!%p3995_p4)
}
  0x8a   : > { %3638 = dma.hbm_to_vmem [thread:$0]  (!%p5478_p1), %s4606_s17, 1024, %s4609_s5, %s5397_s28, %s5398_s1, %s5398_s1, %s5400_s4  }
  0x8b   : > { %s5483_s26 = sand.u32 1, %s4283_s29   ;;  %s3321_s15 = sshll.u32 %s4307_s21, 12 }
  0x8c   : > { %s4640_s8 = sshll.u32 %s5483_s26, 8  ;;  %s5484_s14 = sld [smem:[#allocation63_spill]] }
  0x8d   : > { %s720_s20 = scalar_lea.vmem [#allocation16], %s4640_s8  ;;  %s5415_s5 = scalar_lea.sflag [#allocation17], %s4528_s3 }
  0x8e   : > { %s727_s9 = sshll.u32 %s720_s20, 4  ;;  %s4651_s9 = int_to_ptr.vmem [resolvable:$true] %s727_s9 }
  0x92   : > { %s4648_s10 = scalar_lea.hbm %s5484_s14, %s3321_s15  ;;  %s4004_s25 = scalar_lea.hbm %s5484_s14, 8192 }
  0x93   : > { %s3999_s17 = scalar_lea.hbm %s4648_s10, 4096  ;;  %p4005_p10 = scmp.lt.u32.totalorder %s4648_s10, %s5484_s14 }
  0x94   : > { %p4000_p9 = scmp.ne.s32.totalorder %s4648_s10, %s3999_s17  ;;  %p4006_p0 = scmp.lt.u32.totalorder %s4004_s25, %s3999_s17 }
  0x95   : > { %p4008_p11 = scmp.lt.u32.totalorder %s3999_s17, %s4648_s10 }
  0x96   : > { %p4002_p5 = pnand %p4000_p9, %p4574_p6  ;;  %p4007_p8 = por %p4006_p0, %p4005_p10 }
  0x98   : > { %p4003_p7 = pneg %p4002_p5  ;;  %p4009_p13 = por %p4008_p11, %p4007_p8 }
  0x9a   : > { %p4010_p12 = pnand %p4009_p13, %p4003_p7 }
  0x9c   : > { %4013 = shalt.err (!%p4010_p12)
}
  0x9d   : > { %s4014_s20 = scalar_lea.vmem %s4651_s9, 4096  ;;  %s4322_s28 = smov [#allocation16]  }
  0x9e   : > { %p4015_p2 = scmp.ne.s32.totalorder %s4651_s9, %s4014_s20  ;;  %s4019_s26 = sshll.u32 %s4322_s28, 4  ;;  %s4020_s26 = int_to_ptr.vmem [resolvable:$false] %s4019_s26 }
  0x9f   : > { %s4021_s1 = scalar_lea.vmem %s4020_s26, 8192  ;;  %p4022_p9 = scmp.lt.s32.totalorder %s4651_s9, %s4020_s26 }
  0xa0   : > { %p4017_p3 = pnand %p4015_p2, %p4574_p6  ;;  %p4023_p5 = scmp.lt.s32.totalorder %s4021_s1, %s4014_s20 }
  0xa2   : > { %p4018_p4 = pneg %p4017_p3  ;;  %p4024_p10 = por %p4023_p5, %p4022_p9 }
  0xa4   : > { %p4025_p0 = pnand %p4024_p10, %p4018_p4 }
  0xa6   : > { %4028 = shalt.err (!%p4025_p0)
}
  0xa7   : > { %s4323_s17 = smov 256   ;;  %s4324_s25 = smov 16  }
  0xa8   : > { %3644 = dma.hbm_to_vmem [thread:$0]  (!%p5478_p1), %s4648_s10, 4096, %s4651_s9, %s5415_s5, %s4323_s17, %s4323_s17, %s4324_s25  }
  0xa9   : > { %s5485_s16 = sld [smem:[#allocation65_spill]]  ;;  %s748_s26 = scalar_lea.vmem [#allocation18], %s4640_s8 }
  0xaa   : > { %s4686_s1 = sshll.u32 %s748_s26, 4  ;;  %s4325_s4 = smov [#allocation9]   ;;  %s4845_s1 = int_to_ptr.vmem [resolvable:$true] %s4686_s1 }
  0xab   : > { %s564_s14 = sshll.u32 %s4325_s4, 4  ;;  %s5486_s6 = sld [smem:[#allocation51_spill]]  ;;  %s565_s14 = int_to_ptr.vmem [resolvable:$true] %s564_s14 }
  0xac   : > { %p5487_p11 = scmp.ne.s32.totalorder %s5472_s24, 0 }
  0xae   : > { %p5488_p13 = pneg %p5487_p11 }
  0xaf   : > { %s4683_s28 = scalar_lea.hbm %s5485_s16, %s3321_s15 }
  0xb1   : > { %s4029_s7 = scalar_lea.hbm %s5486_s6, 128 }
  0xb2   : > { %p4030_p8 = scmp.ne.s32.totalorder %s5486_s6, %s4029_s7  ;;  %p4036_p3 = scmp.lt.u32.totalorder %s4029_s7, %s5486_s6 }
  0xb4   : > { %p4032_p12 = pnand %p4030_p8, %p5488_p13 }
  0xb6   : > { %p4033_p2 = pneg %p4032_p12 }
  0xb8   : > { %p4038_p4 = pnand %p4036_p3, %p4033_p2 }
  0xba   : > { %4041 = shalt.err (!%p4038_p4)
}
  0xbb   : > { %s4042_s4 = scalar_lea.vmem %s565_s14, 128  ;;  %p5489_p5 = pmov %p5488_p13 }
  0xbc   : > { %p4043_p9 = scmp.ne.s32.totalorder %s565_s14, %s4042_s4  ;;  %p4050_p7 = scmp.lt.s32.totalorder %s565_s14, %s565_s14 }
  0xbd   : > { %p4051_p1 = scmp.lt.s32.totalorder %s4042_s4, %s4042_s4 }
  0xbe   : > { %p4045_p10 = pnand %p4043_p9, %p5489_p5 }
  0xbf   : > { %p4052_p6 = por %p4051_p1, %p4050_p7 }
  0xc0   : > { %p4046_p0 = pneg %p4045_p10 }
  0xc2   : > { %p4053_p8 = pnand %p4052_p6, %p4046_p0 }
  0xc4   : > { %4056 = shalt.err (!%p4053_p8)
}
  0xc5   : > { %3625 = dma.hbm_to_vmem [thread:$0]  (!%p5487_p11), %s5486_s6, 128, %s565_s14, [#allocation8]  }
  0xc6   : > { %s3152_s7 = sadd.s32 4294967294, %s4315_s2   ;;  %s53_s13 = sadd.s32 1, %s4307_s21 }
  0xc7   : > { %s56_s24 = sadd.s32 1, %s4311_s22  ;;  %p54_p1 = scmp.ge.s32.totalorder %s53_s13, 2 }
  0xc8   : > { %s63_s27 = sadd.s32 1, %s4295_s19  ;;  %p70_p6 = scmp.ne.s32.totalorder %s4295_s19, %s4291_s0 }
  0xc9   : > { %p76_p7 = scmp.ne.s32.totalorder %s4291_s0, %s4287_s30  ;;  %s5571_s13 = smov (%p54_p1, %s53_s13), 0 }
  0xca   : > { %5490 = sst [smem:[#allocation42_spill]] %s5571_s13  ;;  %s5573_s24 = smov (!%p54_p1, %s56_s24), %s4311_s22 }
  0xcb   : > { %p5491_p13 = scmp.eq.s32.totalorder %s4315_s2, 0  ;;  %p5493_p12 = scmp.eq.s32.totalorder %s4490_s23, 0 }
  0xcc   : > { %p58_p3 = scmp.ge.s32.totalorder %s5573_s24, 2  ;;  %s175_s10 = ssub.s32 %s4307_s21, %s5571_s13 }
  0xcd   : > { %p4721_p11 = por %p5491_p13, %p70_p6  ;;  %p4730_p2 = por %p5493_p12, %p76_p7 }
  0xce   : > { %p176_p4 = scmp.eq.s32.totalorder %s175_s10, 0  ;;  %p5495_p9 = scmp.eq.s32.totalorder %s4490_s23, 3 }
  0xcf   : > { %s5494_s8 = scalar_select %p4730_p2, 1, 0 }
  0xd0   : > { %p4738_p5 = por %p5495_p9, %p70_p6  ;;  %s5575_s24 = smov (%p58_p3, %s5573_s24), 0 }
  0xd1   : > { %5498 = sst [smem:[#allocation44_spill]] %s5575_s24  ;;  %s5499_s25 = sadd.s32 1, %s4283_s29 }
  0xd2   : > { %s5496_s17 = scalar_select %p4738_p5, 1, 0 }
  0xd3   : > { %s4747_s18 = scalar_select %p176_p4, %s4283_s29, %s5499_s25  }
  0xd4   : > { %5497 = sst [smem:[#allocation43_spill]] %s5496_s17  ;;  %s60_s20 = ssub.s32 %s4311_s22, %s5575_s24 }
  0xd5   : > { %5500 = sst [smem:[#allocation45_spill]] %s4747_s18  ;;  %p533_p10 = scmp.eq.s32.totalorder %s3152_s7, 3 }
  0xd6   : > { %p61_p0 = scmp.eq.s32.totalorder %s60_s20, 0  ;;  %s578_s26 = sand.u32 1, %s4295_s19  }
  0xd7   : > { %p4755_p8 = por %p533_p10, %p76_p7  ;;  %s3157_s4 = sshll.u32 %s578_s26, 3 }
  0xd8   : > { %s4760_s15 = scalar_select %p61_p0, %s4295_s19, %s63_s27  }
  0xd9   : > { %s5501_s9 = scalar_select %p4755_p8, 1, 0 }
  0xda   : > { %5503 = sst [smem:[#allocation47_spill]] %s4760_s15  ;;  %s3158_s3 = sshll.u32 %s4311_s22, 7 }
  0xdb   : > { %5502 = sst [smem:[#allocation46_spill]] %s5501_s9  ;;  %s582_s7 = scalar_lea.vmem [#allocation4], %s3157_s4 }
  0xdc   : > { %s5504_s5 = sld [smem:[#allocation49_spill]]  ;;  %s589_s25 = sshll.u32 %s582_s7, 4  ;;  %s4776_s25 = int_to_ptr.vmem [resolvable:$true] %s589_s25 }
  0xdd   : > { %p5505_p1 = scmp.lt.s32.totalorder %s4315_s2, 4  ;;  %s579_s24 = scalar_lea.sflag [#allocation5], %s578_s26 }
  0xdf   : > { %p4772_p6 = pnand %p5505_p1, %p4721_p11 }
  0xe1   : > { %p4059_p13 = pneg %p4772_p6 }
  0xe2   : > { %s4766_s6 = scalar_lea.hbm %s5504_s5, %s3158_s3  ;;  %s5507_s3 = sld [smem:[#allocation56_spill]] }
  0xe3   : > { %s4057_s13 = scalar_lea.hbm %s4766_s6, 128  ;;  %s4062_s7 = scalar_lea.hbm %s5504_s5, 256 }
  0xe4   : > { %p4058_p7 = scmp.ne.s32.totalorder %s4766_s6, %s4057_s13  ;;  %p4063_p3 = scmp.lt.u32.totalorder %s4766_s6, %s5504_s5 }
  0xe5   : > { %p4064_p4 = scmp.lt.u32.totalorder %s4062_s7, %s4057_s13  ;;  %p4066_p10 = scmp.lt.u32.totalorder %s4057_s13, %s4766_s6 }
  0xe6   : > { %p4060_p11 = pnand %p4059_p13, %p4058_p7 }
  0xe7   : > { %p4065_p9 = por %p4064_p4, %p4063_p3 }
  0xe8   : > { %s4782_s10 = scalar_lea.hbm %s5507_s3, %s4558_s12  ;;  %p4061_p12 = pneg %p4060_p11 }
  0xe9   : > { %p4067_p0 = por %p4066_p10, %p4065_p9 }
  0xeb   : > { %p4068_p1 = pnand %p4067_p0, %p4061_p12 }
  0xed   : > { %4071 = shalt.err (!%p4068_p1)
}
  0xee   : > { %s4072_s26 = scalar_lea.vmem %s4776_s25, 128  ;;  %s4326_s27 = smov [#allocation4]  }
  0xef   : > { %p4073_p7 = scmp.ne.s32.totalorder %s4776_s25, %s4072_s26  ;;  %s4077_s11 = sshll.u32 %s4326_s27, 4  ;;  %s4078_s11 = int_to_ptr.vmem [resolvable:$false] %s4077_s11 }
  0xf0   : > { %s4079_s21 = scalar_lea.vmem %s4078_s11, 256  ;;  %p4080_p5 = scmp.lt.s32.totalorder %s4776_s25, %s4078_s11 }
  0xf1   : > { %p4075_p11 = pnand %p4073_p7, %p4059_p13  ;;  %p4081_p3 = scmp.lt.s32.totalorder %s4079_s21, %s4072_s26 }
  0xf3   : > { %p4076_p8 = pneg %p4075_p11  ;;  %p4082_p4 = por %p4081_p3, %p4080_p5 }
  0xf5   : > { %p4083_p9 = pnand %p4082_p4, %p4076_p8 }
  0xf7   : > { %4086 = shalt.err (!%p4083_p9)
}
  0xf8   : > { %s5508_s22 = sld [smem:[#allocation40_spill]]  ;;  %s5509_s13 = sld [smem:[#allocation41_spill]] }
  0xf9   : > { %3629 = dma.hbm_to_vmem [thread:$0]  (!%p4772_p6), %s4766_s6, 128, %s4776_s25, %s579_s24  }
  0xfa   : > { %s5510_s27 = sld [smem:[#allocation60_spill]]  ;;  %s4087_s20 = scalar_lea.hbm %s4782_s10, 1024 }
  0xfb   : > { %p4088_p5 = scmp.ne.s32.totalorder %s4782_s10, %s4087_s20  ;;  %s4092_s19 = scalar_lea.hbm %s5507_s3, 2048 }
  0xfc   : > { %p4093_p6 = scmp.lt.u32.totalorder %s4782_s10, %s5507_s3  ;;  %p4094_p10 = scmp.lt.u32.totalorder %s4092_s19, %s4087_s20 }
  0xfd   : > { %p4096_p1 = scmp.lt.u32.totalorder %s4087_s20, %s4782_s10 }
  0xfe   : > { %s633_s14 = scalar_lea.vmem [#allocation12], %s5508_s22  ;;  %p5512_p8 = scmp.ne.s32.totalorder %s5509_s13, 0 }
  0xff   : > { %s640_s4 = sshll.u32 %s633_s14, 4  ;;  %p4095_p0 = por %p4094_p10, %p4093_p6  ;;  %s4810_s4 = int_to_ptr.vmem [resolvable:$true] %s640_s4 }
 0x100   : > { %s5511_s11 = smov %s5510_s27  ;;  %s4816_s21 = scalar_lea.hbm %s5510_s27, %s4558_s12 }
 0x101   : > { %p4090_p13 = pnand %p4088_p5, %p5512_p8  ;;  %p4097_p7 = por %p4096_p1, %p4095_p0 }
 0x103   : > { %p4091_p12 = pneg %p4090_p13 }
 0x105   : > { %p4098_p11 = pnand %p4097_p7, %p4091_p12 }
 0x107   : > { %4101 = shalt.err (!%p4098_p11)
}
 0x108   : > { %s4102_s12 = scalar_lea.vmem %s4810_s4, 1024  ;;  %s4327_s5 = smov [#allocation12]  }
 0x109   : > { %p4103_p3 = scmp.ne.s32.totalorder %s4810_s4, %s4102_s12  ;;  %s4107_s24 = sshll.u32 %s4327_s5, 4  ;;  %s4108_s24 = int_to_ptr.vmem [resolvable:$false] %s4107_s24 }
 0x10a   : > { %s4109_s18 = scalar_lea.vmem %s4108_s24, 2048  ;;  %p4110_p5 = scmp.lt.s32.totalorder %s4810_s4, %s4108_s24 }
 0x10b   : > { %p4105_p4 = pnand %p4103_p3, %p5512_p8  ;;  %p4111_p13 = scmp.lt.s32.totalorder %s4109_s18, %s4102_s12 }
 0x10d   : > { %p4106_p9 = pneg %p4105_p4  ;;  %p4112_p6 = por %p4111_p13, %p4110_p5 }
 0x10f   : > { %p4113_p10 = pnand %p4112_p6, %p4106_p9 }
 0x111   : > { %4116 = shalt.err (!%p4113_p10)
}
 0x112   : > { %s5513_s19 = sld [smem:[#allocation38_spill]]  ;;  %s5515_s15 = smov 4  }
 0x113   : > { %s5516_s25 = smov 64   ;;  %s5517_s14 = sld [smem:[#allocation39_spill]] }
 0x114   : > { %s687_s26 = scalar_lea.vmem [#allocation15], %s5508_s22  ;;  %s4117_s20 = scalar_lea.hbm %s4816_s21, 1024 }
 0x115   : > { %s694_s27 = sshll.u32 %s687_s26, 4  ;;  %p4118_p0 = scmp.ne.s32.totalorder %s4816_s21, %s4117_s20  ;;  %s4848_s27 = int_to_ptr.vmem [resolvable:$true] %s694_s27 }
 0x116   : > { %s4122_s5 = scalar_lea.hbm %s5511_s11, 2048  ;;  %p4123_p11 = scmp.lt.u32.totalorder %s4816_s21, %s5511_s11 }
 0x117   : > { %p4120_p1 = pnand %p4118_p0, %p5512_p8  ;;  %p4124_p3 = scmp.lt.u32.totalorder %s4122_s5, %s4117_s20 }
 0x118   : > { %p5514_p12 = scmp.ne.s32.totalorder %s5513_s19, 0  ;;  %p4126_p9 = scmp.lt.u32.totalorder %s4117_s20, %s4816_s21 }
 0x119   : > { %s5518_s7 = scalar_lea.sflag [#allocation11], %s5517_s14  ;;  %p4121_p7 = pneg %p4120_p1 }
 0x11a   : > { %3635 = dma.hbm_to_vmem [thread:$0]  (!%p5514_p12), %s4782_s10, 1024, %s4810_s4, %s5518_s7, %s5516_s25, %s5516_s25, %s5515_s15  }
 0x11b   : > { %p4125_p4 = por %p4124_p3, %p4123_p11 }
 0x11d   : > { %p4127_p5 = por %p4126_p9, %p4125_p4 }
 0x11f   : > { %p4128_p13 = pnand %p4127_p5, %p4121_p7 }
 0x121   : > { %4131 = shalt.err (!%p4128_p13)
}
 0x122   : > { %s4132_s10 = scalar_lea.vmem %s4848_s27, 1024  ;;  %s4328_s22 = smov [#allocation15]  }
 0x123   : > { %p4133_p6 = scmp.ne.s32.totalorder %s4848_s27, %s4132_s10  ;;  %s4137_s4 = sshll.u32 %s4328_s22, 4  ;;  %s4138_s4 = int_to_ptr.vmem [resolvable:$false] %s4137_s4 }
 0x124   : > { %s4139_s7 = scalar_lea.vmem %s4138_s4, 2048  ;;  %p4140_p1 = scmp.lt.s32.totalorder %s4848_s27, %s4138_s4 }
 0x125   : > { %p4135_p10 = pnand %p4133_p6, %p5512_p8  ;;  %p4141_p2 = scmp.lt.s32.totalorder %s4139_s7, %s4132_s10 }
 0x127   : > { %p4136_p0 = pneg %p4135_p10  ;;  %p4142_p11 = por %p4141_p2, %p4140_p1 }
 0x129   : > { %p4143_p3 = pnand %p4142_p11, %p4136_p0 }
 0x12b   : > { %4146 = shalt.err (!%p4143_p3)
}
 0x12c   : > { %s5519_s26 = scalar_lea.sflag [#allocation14], %s5517_s14  ;;  %s4147_s20 = scalar_lea.hbm %s4683_s28, 4096 }
 0x12d   : > { %3641 = dma.hbm_to_vmem [thread:$0]  (!%p5514_p12), %s4816_s21, 1024, %s4848_s27, %s5519_s26, %s5516_s25, %s5516_s25, %s5515_s15  }
 0x12e   : > { %p4148_p7 = scmp.ne.s32.totalorder %s4683_s28, %s4147_s20  ;;  %s4152_s5 = scalar_lea.hbm %s5485_s16, 8192 }
 0x12f   : > { %p4153_p9 = scmp.lt.u32.totalorder %s4683_s28, %s5485_s16  ;;  %p4154_p5 = scmp.lt.u32.totalorder %s4152_s5, %s4147_s20 }
 0x130   : > { %p4150_p2 = pnand %p4148_p7, %p5512_p8  ;;  %p4156_p6 = scmp.lt.u32.totalorder %s4147_s20, %s4683_s28 }
 0x131   : > { %p4155_p13 = por %p4154_p5, %p4153_p9 }
 0x132   : > { %p4151_p4 = pneg %p4150_p2 }
 0x133   : > { %p4157_p10 = por %p4156_p6, %p4155_p13 }
 0x135   : > { %p4158_p0 = pnand %p4157_p10, %p4151_p4 }
 0x137   : > { %4161 = shalt.err (!%p4158_p0)
}
 0x138   : > { %s4162_s21 = scalar_lea.vmem %s4845_s1, 4096  ;;  %s4329_s27 = smov [#allocation18]  }
 0x139   : > { %p4163_p1 = scmp.ne.s32.totalorder %s4845_s1, %s4162_s21  ;;  %s4167_s10 = sshll.u32 %s4329_s27, 4  ;;  %s4168_s10 = int_to_ptr.vmem [resolvable:$false] %s4167_s10 }
 0x13a   : > { %s4169_s22 = scalar_lea.vmem %s4168_s10, 8192  ;;  %p4170_p7 = scmp.lt.s32.totalorder %s4845_s1, %s4168_s10 }
 0x13b   : > { %p4165_p11 = pnand %p4163_p1, %p5512_p8  ;;  %p4171_p2 = scmp.lt.s32.totalorder %s4169_s22, %s4162_s21 }
 0x13d   : > { %p4166_p3 = pneg %p4165_p11  ;;  %p4172_p9 = por %p4171_p2, %p4170_p7 }
 0x13f   : > { %p4173_p5 = pnand %p4172_p9, %p4166_p3 }
 0x141   : > { %4176 = shalt.err (!%p4173_p5)
}
 0x142   : > { %s5520_s4 = scalar_lea.sflag [#allocation17], %s5517_s14  ;;  %s5521_s13 = sld [smem:[#allocation37_spill]] }
 0x143   : > { %3647 = dma.hbm_to_vmem [thread:$0]  (!%p5514_p12), %s4683_s28, 4096, %s4845_s1, %s5520_s4, %s5516_s25, %s5516_s25, %s5515_s15  }
 0x148   : > { %p5522_p8 = scmp.ne.s32.totalorder %s5521_s13, 0 }
 0x14a   : > { %773 = sbr.rel (%p5522_p8) target bundleno = 4406 (0x1136), region = 92 }
 0x151   : > { %s4905_s7 = sand.u32 1, %s4291_s0   ;;  %p5523_p4 = scmp.ne.s32.totalorder %s5494_s8, 0 }
 0x152   : > { %s5425_s26 = sshll.u32 %s4905_s7, 3  ;;  %s776_s19 = scalar_lea.sflag [#allocation5], %s4905_s7 }
 0x153   : > { %s4911_s20 = scalar_lea.vmem [#allocation4], %s5425_s26 }
 0x154   : > { %4250 = dma.done.wait (%p5523_p4), %s776_s19, 128  }
 0x155   : > { %4252 = vsyncadd (%p5523_p4), %s776_s19, 4294967168  ;;  %p5524_p12 = scmp.eq.s32.totalorder %s4490_s23, 0 }
 0x157   : > { %4254 = dma.done.wait (%p5524_p12), [#allocation8], 256   ;;  %p5525_p13 = pmov %p5524_p12 }
 0x158   : > { %s5526_s28 = sld [smem:[#allocation26_spill]]  ;;  %s5527_s1 = sld [smem:[#allocation36_spill]] }
 0x159   : > { %4256 = vsyncadd (%p5525_p13), [#allocation8], 4294967040  ;;  %s792_s15 = sand.u32 1, %s4490_s23  }
 0x15a   : > { %s793_s6 = scalar_lea.sflag [#allocation11], %s792_s15 }
 0x15e   : > { %s794_s25 = sand.u32 1, %s5526_s28   ;;  %p5528_p6 = scmp.ne.s32.totalorder %s5527_s1, 0 }
 0x15f   : > { %s3181_s14 = sshll.u32 %s794_s25, 6 }
 0x160   : > { %s4923_s12 = scalar_lea.vmem [#allocation10], %s3181_s14 }
 0x161   : > { %4258 = dma.done.wait (%p5528_p6), %s793_s6, 2048  }
 0x162   : > { %4260 = vsyncadd (%p5528_p6), %s793_s6, 4294965248  ;;  %s4929_s8 = scalar_lea.vmem [#allocation12], %s3181_s14  ;;  %s811_s5 = scalar_lea.sflag [#allocation14], %s792_s15 }
 0x163   : > { %s4931_s24 = scalar_lea.vmem [#allocation13], %s3181_s14 }
 0x164   : > { %4262 = dma.done.wait (%p5528_p6), %s811_s5, 2048  }
 0x165   : > { %4264 = vsyncadd (%p5528_p6), %s811_s5, 4294965248  ;;  %s3185_s23 = sshll.u32 %s794_s25, 8  ;;  %s4937_s18 = scalar_lea.vmem [#allocation15], %s3181_s14 }
 0x166   : > { %s829_s21 = scalar_lea.sflag [#allocation17], %s792_s15  ;;  %s4939_s27 = scalar_lea.vmem [#allocation16], %s3185_s23 }
 0x167   : > { %5529 = sst [smem:[#allocation48_spill]] %s4939_s27 }
 0x168   : > { %4266 = dma.done.wait (%p5528_p6), %s829_s21, 8192  }
 0x169   : > { %4268 = vsyncadd (%p5528_p6), %s829_s21, 4294959104  ;;  %s5530_s10 = sld [smem:[#allocation31_spill]]  ;;  %s5533_s21 = sld [smem:[#allocation57_spill]] }
 0x16a   : > { %s5534_s16 = sld [smem:[#allocation59_spill]]  ;;  %s5535_s29 = sld [smem:[#allocation61_spill]] }
 0x16b   : > { %s5536_s17 = sld [smem:[#allocation62_spill]]  ;;  %s5537_s15 = sld [smem:[#allocation66_spill]] }
 0x16c   : > { %s5538_s5 = sld [smem:[#allocation64_spill]]  ;;  %s4983_s3 = scalar_lea.vmem [#allocation18], %s3185_s23 }
 0x16f   : > { %p949_p10 = scmp.lt.s32.totalorder %s5530_s10, 1  ;;  %p3189_p0 = scmp.ne.s32.totalorder %s5530_s10, 0 }
 0x170   : > { %v979_v0 = vld [vmem:[%s4911_s20] sm:$0xff] (!%p3189_p0) }
 0x171   : > { %s4947_s22 = scalar_select %p949_p10, %s5530_s10, 1 }
 0x172   : > { %978 = sbr.rel (%p3189_p0) target bundleno = 377 (0x179), region = 132  ;;  %980 = vst [vmem:[#allocation2] sm:$0xff] (!%p3189_p0), %v979_v0 }
 0x173   : > { %s957_s26 = scalar_lea.vmem %s5533_s21, %s4947_s22  ;;  %s960_s4 = scalar_lea.vmem %s5534_s16, %s4947_s22 }
 0x174   : > { %s963_s9 = scalar_lea.vmem %s5535_s29, %s4947_s22  ;;  %s966_s19 = scalar_lea.vmem %s5536_s17, %s4947_s22 }
 0x175   : > { %s3188_s28 = sshll.u32 %s4947_s22, 2  ;;  %s973_s25 = scalar_lea.vmem %s5537_s15, %s4947_s22 }
 0x176   : > { %s4981_s21 = scalar_lea.vmem %s5538_s5, %s3188_s28  ;;  %s5539_s16 = sshll.u32 %s4905_s7, 3 }
 0x177   : > { %s4987_s11 = scalar_lea.vmem [#allocation19], %s5539_s16 }
 0x179 PF: > { %v4991_v1 = vld [vmem:[#allocation2] sm:$0xff]  ;;  %v4330_v3 = vmov 0.0   ;;  %v3762_v4 = vld [vmem:[%s4923_s12] sm:$0xff]   ;;  %v3764_v6 = vld [vmem:[%s4923_s12 + $0x8] sm:$0xff]   ;;  %vm4331_vm0 = vmmov 0   ;;  %s5540_s0 = sld [smem:[#allocation53_spill]] }
 0x17a   : > { %v983_v2 = vmul.f32 %v4991_v1, %v4991_v1  ;;  %3430 = vmatprep.subr.bf16.mxu0 %v4330_v3  ;;  %3450 = vmatprep.subr.bf16.mxu1 %v4330_v3  ;;  %v3763_v5 = vld [vmem:[%s4929_s8] sm:$0xff]   ;;  %v3765_v7 = vld [vmem:[%s4929_s8 + $0x8] sm:$0xff]   ;;  %v3766_v8 = vld [vmem:[%s4923_s12 + $0x10] sm:$0xff]   ;;  %vm1354_vm1 = vcmask 130048   ;;  %vm1465_vm2 = vcmask 1043456   ;;  %s5546_s1 = sld [smem:[#allocation52_spill]] }
 0x17b   : > { %3431 = vmatpush3.bf16.msra.mxu0 %v3762_v4  ;;  %3451 = vmatpush3.bf16.msra.mxu1 %v3763_v5  ;;  %v3767_v9 = vld [vmem:[%s4929_s8 + $0x10] sm:$0xff]   ;;  %v3768_v10 = vld [vmem:[%s4923_s12 + $0x18] sm:$0xff]   ;;  %v3770_v12 = vld [vmem:[%s4923_s12 + $0x20] sm:$0xff]   ;;  %vm1449_vm3 = vcmask 64512   ;;  %s4333_s15 = smov 48   ;;  %s4334_s6 = smov 112  }
 0x17c   : > { %984 = vadd.xlane.f32.xlu0 %v983_v2  ;;  %3432 = vmatprep.subr.bf16.mxu0 %v4330_v3  ;;  %v3769_v11 = vld [vmem:[%s4929_s8 + $0x18] sm:$0xff]   ;;  %v3771_v13 = vld [vmem:[%s4929_s8 + $0x20] sm:$0xff]   ;;  %v3772_v14 = vld [vmem:[%s4923_s12 + $0x28] sm:$0xff]   ;;  %vm1510_vm4 = vcmask 257024   ;;  %s4335_s5 = smov 96   ;;  %s4336_s16 = smov 32  }
 0x17d   : > { %3452 = vmatprep.subr.bf16.mxu1 %v4330_v3  ;;  %3446 = vmatprep.mubr.msk.bf16.mxu0 %vm4331_vm0, %v4330_v3  ;;  %v3773_v15 = vld [vmem:[%s4929_s8 + $0x28] sm:$0xff]   ;;  %v3774_v16 = vld [vmem:[%s4923_s12 + $0x30] sm:$0xff]   ;;  %v3776_v18 = vld [vmem:[%s4923_s12 + $0x38] sm:$0xff]   ;;  %s5542_s12 = sld [smem:[#allocation55_spill]]  ;;  %s4337_s29 = smov 16   ;;  %vm1682_vm5 = vcmask 519424  }
 0x17e   : > { %3466 = vmatprep.mubr.msk.bf16.mxu1 %vm4331_vm0, %v4330_v3  ;;  %v3775_v17 = vld [vmem:[%s4929_s8 + $0x30] sm:$0xff]   ;;  %v3777_v19 = vld [vmem:[%s4929_s8 + $0x38] sm:$0xff]   ;;  %v3778_v27 = vld [vmem:[%s4931_s24] sm:$0xff]   ;;  %s4338_s30 = smov 80   ;;  %vm1853_vm6 = vcmask 781824   ;;  %vm2024_vm7 = vcmask 1044224  }
 0x17f   : > { %3433 = vmatpush3.bf16.msra.mxu0 %v3764_v6  ;;  %3453 = vmatpush3.bf16.msra.mxu1 %v3765_v7  ;;  %s5541_s2 = scalar_lea.vmem %s5540_s0, %s4947_s22  ;;  %v3779_v29 = vld [vmem:[%s4931_s24 + $0x8] sm:$0xff]   ;;  %v3780_v30 = vld [vmem:[%s4931_s24 + $0x10] sm:$0xff]   ;;  %v3781_v31 = vld [vmem:[%s4931_s24 + $0x18] sm:$0xff]   ;;  %s5547_s0 = sld [smem:[#allocation48_spill]] }
 0x180   : > { %3434 = vmatprep.subr.bf16.mxu0 %v4330_v3  ;;  %3454 = vmatprep.subr.bf16.mxu1 %v4330_v3  ;;  %v3190_v24 = vld [vmem:[%s5541_s2] ss:$0 sm:$0xff]  ;;  %v3782_v32 = vld [vmem:[%s4931_s24 + $0x20] sm:$0xff]   ;;  %v3783_v33 = vld [vmem:[%s4931_s24 + $0x28] sm:$0xff]  }
 0x181   : > { %v3784_v34 = vld [vmem:[%s4931_s24 + $0x30] sm:$0xff]   ;;  %v3785_v35 = vld [vmem:[%s4931_s24 + $0x38] sm:$0xff]   ;;  %s4332_s24 = smov 64  }
 0x182   : > { %v3200_v37 = vld [vmem:[%s957_s26] ss:$0 sm:$0xff]  ;;  %v1334_v53 = vld [vmem:[#allocation9] sm:$0xff] }
 0x183   : > { %3435 = vmatpush3.bf16.msra.mxu0 %v3766_v8  ;;  %3455 = vmatpush3.bf16.msra.mxu1 %v3767_v9  ;;  %s5543_s8 = scalar_lea.vmem %s5542_s12, %s4947_s22  ;;  %v1333_v52 = vld [vmem:[#allocation7] sm:$0xff] }
 0x184   : > { %3436 = vmatprep.subr.bf16.mxu0 %v4330_v3  ;;  %3456 = vmatprep.subr.bf16.mxu1 %v4330_v3  ;;  %v3191_v36 = vld [vmem:[%s5543_s8] ss:$0 sm:$0xff]  ;;  %s5551_s8 = sld [smem:[#allocation31_spill]] }
 0x185   : > { %v3209_v5 = vld [vmem:[%s960_s4] ss:$0 sm:$0xff] }
 0x187   : > { %3437 = vmatpush3.bf16.msra.mxu0 %v3768_v10  ;;  %3457 = vmatpush3.bf16.msra.mxu1 %v3769_v11  ;;  %v5106_v10 = vld [vmem:[%s5546_s1] sm:$0xff] }
 0x188   : > { %3438 = vmatprep.subr.bf16.mxu0 %v4330_v3  ;;  %3458 = vmatprep.subr.bf16.mxu1 %v4330_v3 }
 0x18a   : > { %p3312_p1 = scmp.ne.s32.totalorder %s5551_s8, 1 }
 0x18b   : > { %3439 = vmatpush3.bf16.msra.mxu0 %v3770_v12  ;;  %3459 = vmatpush3.bf16.msra.mxu1 %v3771_v13 }
 0x18c   : > { %3440 = vmatprep.subr.bf16.mxu0 %v4330_v3  ;;  %3460 = vmatprep.subr.bf16.mxu1 %v4330_v3 }
 0x18f   : > { %3441 = vmatpush3.bf16.msra.mxu0 %v3772_v14  ;;  %3461 = vmatpush3.bf16.msra.mxu1 %v3773_v15 }
 0x190   : > { %3442 = vmatprep.subr.bf16.mxu0 %v4330_v3  ;;  %3462 = vmatprep.subr.bf16.mxu1 %v4330_v3 }
 0x193   : > { %3443 = vmatpush3.bf16.msra.mxu0 %v3774_v16  ;;  %3463 = vmatpush3.bf16.msra.mxu1 %v3775_v17 }
 0x194   : > { %3444 = vmatprep.subr.bf16.mxu0 %v4330_v3  ;;  %3464 = vmatprep.subr.bf16.mxu1 %v4330_v3 }
 0x197   : > { %3445 = vmatpush3.bf16.msra.mxu0 %v3776_v18  ;;  %3465 = vmatpush3.bf16.msra.mxu1 %v3777_v19 }
 0x198   : > { %3470 = vmatprep.subr.bf16.mxu0 %v4330_v3  ;;  %3490 = vmatprep.subr.bf16.mxu1 %v4330_v3 }
 0x209   : > { %v985_v20 = vpop.xlane.xlu0 %984 }
 0x20a   : > { %v987_v21 = vmul.f32 0.0078125, %v985_v20 }
 0x20c   : > { %v988_v22 = vadd.f32 1e-06, %v987_v21 }
 0x20e   : > { %3874 = vrsqrt.f32 %v988_v22 }
 0x218   : > { %v3875_v23 = vpop.eup %3874 }
 0x219   : > { %v990_v25 = vmul.f32 %v3875_v23, %v4991_v1 }
 0x21b   : > { %v997_v26 = vmul.f32 %v3190_v24, %v990_v25 }
 0x21d   : > { %v998_v28 = vpack.c.bf16 %v997_v26, %v997_v26 }
 0x21f   : > { %3447 = vmatmul.mubr.bf16.vlgmr.msra.gmra.mrb[0].mxu0 %v998_v28  ;;  %3467 = vmatmul.mubr.bf16.vlgmr.msra.gmra.mrb[0].mxu1 %v998_v28 }
 0x220   : > { %3471 = vmatpush3.bf16.msra.mxu0 %v3778_v27  ;;  %3486 = vmatprep.mubr.msk.bf16.mxu0 %vm4331_vm0, %v4330_v3 }
 0x221   : > { %3472 = vmatprep.subr.bf16.mxu0 %v4330_v3  ;;  %3492 = vmatprep.mubr.msk.bf16.mxu1 %vm4331_vm0, %v4330_v3 }
 0x224   : > { %3473 = vmatpush3.bf16.msra.mxu0 %v3779_v29 }
 0x225   : > { %3474 = vmatprep.subr.bf16.mxu0 %v4330_v3 }
 0x228   : > { %3475 = vmatpush3.bf16.msra.mxu0 %v3780_v30 }
 0x229   : > { %3476 = vmatprep.subr.bf16.mxu0 %v4330_v3 }
 0x22c   : > { %3477 = vmatpush3.bf16.msra.mxu0 %v3781_v31 }
 0x22d   : > { %3478 = vmatprep.subr.bf16.mxu0 %v4330_v3 }
 0x230   : > { %3479 = vmatpush3.bf16.msra.mxu0 %v3782_v32 }
 0x231   : > { %3480 = vmatprep.subr.bf16.mxu0 %v4330_v3 }
 0x234   : > { %3481 = vmatpush3.bf16.msra.mxu0 %v3783_v33 }
 0x235   : > { %3482 = vmatprep.subr.bf16.mxu0 %v4330_v3 }
 0x238   : > { %3483 = vmatpush3.bf16.msra.mxu0 %v3784_v34 }
 0x239   : > { %3484 = vmatprep.subr.bf16.mxu0 %v4330_v3 }
 0x23c   : > { %3485 = vmatpush3.bf16.msra.mxu0 %v3785_v35 }
 0x23d   : > { %3532 = vmatprep.subr.bf16.mxu0 %v4330_v3 }
 0x23f   : > { %3487 = vmatmul.mubr.bf16.vlgmr.msra.gmra.mrb[4].mxu0 %v998_v28 }
 0x240   : > { %3534 = vmatprep.mubr.msk.bf16.mxu0 %vm4331_vm0, %v4330_v3 }
 0x2f2   : > { %v1104_v38 = vpop.f32.mrb[0].mxu0  ;;  %v1215_v39 = vpop.f32.mrb[0].mxu1 }
 0x2f3   : > { %v1105_v40 = vadd.f32 %v3191_v36, %v1104_v38  ;;  %v1216_v41 = vadd.f32 %v3200_v37, %v1215_v39  ;;  %v3448_v42 = vpop.f32.mrb[1].mxu0  ;;  %v3468_v43 = vpop.f32.mrb[1].mxu1 }
 0x2f4   : > { %v1107_v44 = vpop.f32.mrb[2].mxu0  ;;  %v1218_v45 = vpop.f32.mrb[2].mxu1 }
 0x2f5   : > { %1342 = vrot.lane.b32.xlu0 %v1216_v41, %s4332_s24  ;;  %v3469_v46 = vpop.f32.mrb[3].mxu1  ;;  %1336 = vrot.lane.b32.xlu1 %v1105_v40, %s4332_s24  ;;  %v3449_v47 = vpop.f32.mrb[3].mxu0  ;;  %v1341_v56 = vmul.f32 %v1333_v52, %v1216_v41  ;;  %v1335_v59 = vmul.f32 %v1333_v52, %v1105_v40 }
 0x312   : > { %v1326_v48 = vpop.f32.mrb[4].mxu0 }
 0x313   : > { %v3488_v49 = vpop.f32.mrb[5].mxu0  ;;  %v1327_v6 = vadd.f32 %v3209_v5, %v1326_v48 }
 0x314   : > { %v1329_v50 = vpop.f32.mrb[6].mxu0 }
 0x315   : > { %v3489_v51 = vpop.f32.mrb[7].mxu0  ;;  %v5094_v7 = vpack.c.bf16 %v1327_v6, %v1327_v6 }
 0x317   : > { %v1467_v8 = vsel %vm1465_vm2, %v5094_v7, 0 }
 0x367   : > { %v1343_v54 = vpop.permute.xlu0 %1342  ;;  %v1337_v55 = vpop.permute.xlu1 %1336 }
 0x368   : > { %v1344_v57 = vmul.f32 %v1343_v54, %v1334_v53  ;;  %v1338_v58 = vmul.f32 %v1337_v55, %v1334_v53 }
 0x36a   : > { %v1345_v60 = vadd.f32 %v1344_v57, %v1341_v56  ;;  %v1339_v62 = vadd.f32 %v1338_v58, %v1335_v59 }
 0x36c   : > { %v5073_v61 = vpack.c.bf16 %v1345_v60, %v1345_v60  ;;  %v5077_v63 = vpack.c.bf16 %v1339_v62, %v1339_v62 }
 0x36e   : > { %1352 = vrot.lane.b32.xlu1 %v5073_v61, %s4332_s24  ;;  %v1405_v4 = vsel %vm1354_vm1, %v5073_v61, 0 }
 0x372   : > { %1349 = vrot.lane.b32.xlu1 %v5077_v63, %s4332_s24 }
 0x3e0   : > { %v1353_v0 = vpop.permute.xlu1 %1352 }
 0x3e1   : > { %v1359_v1 = vsel %vm1354_vm1, %v1353_v0, 0 }
 0x3e2   : > { %3491 = vmatpush3.bf16.xpose.msra.mxu1 %v1359_v1 }
 0x3e3   : > { %3496 = vmatprep.subr.bf16.mxu1 %v4330_v3 }
 0x3e4   : > { %v1350_v2 = vpop.permute.xlu1 %1349 }
 0x3e9   : > { %3493 = vmatmul.mubr.msk.bf16.vlgmr.msra.gmra.mrb[4].mxu1 %vm1354_vm1, %v1350_v2 }
 0x3ea   : > { %3497 = vmatpush3.bf16.xpose.msra.mxu1 %v1405_v4  ;;  %3498 = vmatprep.mubr.msk.bf16.mxu1 %vm4331_vm0, %v4330_v3 }
 0x3eb   : > { %3502 = vmatprep.subr.bf16.mxu1 %v4330_v3 }
 0x3f5   : > { %3499 = vmatmul.mubr.msk.bf16.vlgmr.msra.gmra.mrb[4].mxu1 %vm1354_vm1, %v5077_v63 }
 0x3f6   : > { %3503 = vmatpush3.bf16.msra.mxu1 %v1467_v8  ;;  %3504 = vmatprep.mubr.msk.bf16.mxu1 %vm4331_vm0, %v4330_v3 }
 0x3f7   : > { %3508 = vmatprep.subr.bf16.mxu1 %v4330_v3 }
 0x4c8   : > { %v1441_v9 = vpop.f32.mrb[4].mxu1 }
 0x4c9   : > { %v1447_v11 = vmul.f32 0.17677669, %v1441_v9  ;;  %v3500_v12 = vpop.f32.mrb[5].mxu1 }
 0x4ca   : > { %v1444_v13 = vpop.f32.mrb[6].mxu1 }
 0x4cb   : > { %v3501_v14 = vpop.f32.mrb[7].mxu1  ;;  %v1448_v15 = vadd.f32 %v1447_v11, %v5106_v10 }
 0x4cd   : > { %v1450_v16 = vsel %vm1449_vm3, %v1448_v15, -inf }
 0x4ce   : > { %1451 = vmax.xlane.f32.xlu1 %v1450_v16 }
 0x4df   : > { %1514 = vrot.lane.b32.xlu1 %v5073_v61, %s4333_s15 }
 0x4e3   : > { %1564 = vrot.lane.b32.xlu1 %v5073_v61, %s4334_s6 }
 0x4e7   : > { %1562 = vrot.lane.b32.xlu1 %v5077_v63, %s4334_s6 }
 0x55b   : > { %v1452_v17 = vpop.xlane.xlu1 %1451 }
 0x55c   : > { %v1453_v18 = vsub.f32 %v1448_v15, %v1452_v17 }
 0x55e   : > { %v1454_v19 = vmul.f32 1.442695, %v1453_v18 }
 0x55f   : > { %v1515_v25 = vpop.permute.xlu1 %1514 }
 0x560   : > { %3876 = vpow2.f32 %v1454_v19  ;;  %v1520_v27 = vsel %vm1354_vm1, %v1515_v25, 0 }
 0x563   : > { %v1565_v28 = vpop.permute.xlu1 %1564 }
 0x564   : > { %v1570_v30 = vsel %vm1354_vm1, %v1565_v28, 0 }
 0x567   : > { %v1563_v31 = vpop.permute.xlu1 %1562 }
 0x56a   : > { %v3877_v20 = vpop.eup %3876 }
 0x56b   : > { %v1456_v21 = vsel %vm1449_vm3, %v3877_v20, 0.0 }
 0x56c   : > { %1457 = vadd.xlane.f32.xlu0 %v1456_v21 }
 0x582   : > { %1512 = vrot.lane.b32.xlu0 %v5077_v63, %s4333_s15 }
 0x5f9   : > { %v1458_v22 = vpop.xlane.xlu0 %1457 }
 0x5fa   : > { %3878 = vrcp.f32 %v1458_v22 }
 0x5fd   : > { %v1513_v29 = vpop.permute.xlu0 %1512 }
 0x604   : > { %v3879_v23 = vpop.eup %3878 }
 0x605   : > { %v1460_v24 = vmul.f32 %v3879_v23, %v3877_v20 }
 0x607   : > { %v1461_v26 = vpack.c.bf16 %v1460_v24, %v1460_v24 }
 0x609   : > { %3505 = vmatmul.mubr.msk.bf16.vlgmr.msra.gmra.mrb[8].mxu1 %vm1449_vm3, %v1461_v26 }
 0x60a   : > { %3509 = vmatpush3.bf16.xpose.msra.mxu1 %v1520_v27  ;;  %3510 = vmatprep.mubr.msk.bf16.mxu1 %vm4331_vm0, %v4330_v3 }
 0x60b   : > { %3514 = vmatprep.subr.bf16.mxu1 %v4330_v3 }
 0x611   : > { %3511 = vmatmul.mubr.msk.bf16.vlgmr.msra.gmra.mrb[12].mxu1 %vm1354_vm1, %v1513_v29 }
 0x612   : > { %3515 = vmatpush3.bf16.xpose.msra.mxu1 %v1570_v30  ;;  %3516 = vmatprep.mubr.msk.bf16.mxu1 %vm4331_vm0, %v4330_v3 }
 0x613   : > { %3520 = vmatprep.subr.bf16.mxu1 %v4330_v3 }
 0x61d   : > { %3517 = vmatmul.mubr.msk.bf16.vlgmr.msra.gmra.mrb[12].mxu1 %vm1354_vm1, %v1563_v31 }
 0x61e   : > { %3522 = vmatprep.mubr.msk.bf16.mxu1 %vm4331_vm0, %v4330_v3 }
 0x6dc   : > { %v1503_v32 = vpop.f32.mrb[8].mxu1 }
 0x6dd   : > { %v1509_v33 = vpack.c.bf16 %v1503_v32, %v1503_v32  ;;  %v3506_v34 = vpop.f32.mrb[9].mxu1 }
 0x6de   : > { %v1506_v35 = vpop.f32.mrb[10].mxu1 }
 0x6df   : > { %1511 = vst.msk [vmem:[#allocation3] sm:$0xf] %vm1510_vm4, %v1509_v33  ;;  %v3507_v36 = vpop.f32.mrb[11].mxu1 }
 0x6f0   : > { %v1606_v37 = vpop.f32.mrb[12].mxu1 }
 0x6f1   : > { %v1612_v38 = vmul.f32 0.17677669, %v1606_v37  ;;  %v3518_v39 = vpop.f32.mrb[13].mxu1 }
 0x6f2   : > { %v1609_v40 = vpop.f32.mrb[14].mxu1 }
 0x6f3   : > { %v3519_v41 = vpop.f32.mrb[15].mxu1  ;;  %v1613_v42 = vadd.f32 %v1612_v38, %v5106_v10 }
 0x6f5   : > { %v1614_v43 = vsel %vm1449_vm3, %v1613_v42, -inf }
 0x6f6   : > { %1615 = vmax.xlane.f32.xlu1 %v1614_v43 }
 0x707   : > { %1627 = vrot.lane.b32.xlu1 %v5094_v7, %s4335_s5 }
 0x70b   : > { %1736 = vrot.lane.b32.xlu1 %v5073_v61, %s4335_s5 }
 0x70f   : > { %1684 = vrot.lane.b32.xlu1 %v5077_v63, %s4336_s16 }
 0x783   : > { %v1616_v44 = vpop.xlane.xlu1 %1615 }
 0x784   : > { %v1617_v45 = vsub.f32 %v1613_v42, %v1616_v44 }
 0x786   : > { %v1618_v46 = vmul.f32 1.442695, %v1617_v45 }
 0x787   : > { %v1628_v47 = vpop.permute.xlu1 %1627 }
 0x788   : > { %3880 = vpow2.f32 %v1618_v46  ;;  %v1633_v48 = vsel %vm1465_vm2, %v1628_v47, 0 }
 0x789   : > { %3521 = vmatpush3.bf16.msra.mxu1 %v1633_v48 }
 0x78a   : > { %3526 = vmatprep.subr.bf16.mxu1 %v4330_v3 }
 0x78b   : > { %v1737_v49 = vpop.permute.xlu1 %1736 }
 0x78c   : > { %v1742_v50 = vsel %vm1354_vm1, %v1737_v49, 0 }
 0x78d   : > { %3533 = vmatpush3.bf16.xpose.msra.mxu0 %v1742_v50 }
 0x78e   : > { %3556 = vmatprep.subr.bf16.mxu0 %v4330_v3 }
 0x78f   : > { %v1685_v60 = vpop.permute.xlu1 %1684 }
 0x792   : > { %v3881_v51 = vpop.eup %3880 }
 0x793   : > { %v1620_v52 = vsel %vm1449_vm3, %v3881_v51, 0.0 }
 0x794   : > { %1621 = vadd.xlane.f32.xlu0 %v1620_v52 }
 0x7aa   : > { %1686 = vrot.lane.b32.xlu0 %v5073_v61, %s4336_s16 }
 0x7ae   : > { %1734 = vrot.lane.b32.xlu0 %v5077_v63, %s4335_s5 }
 0x821   : > { %v1622_v53 = vpop.xlane.xlu0 %1621 }
 0x822   : > { %3882 = vrcp.f32 %v1622_v53 }
 0x825   : > { %v1687_v54 = vpop.permute.xlu0 %1686 }
 0x826   : > { %v1692_v59 = vsel %vm1354_vm1, %v1687_v54, 0 }
 0x829   : > { %v1735_v55 = vpop.permute.xlu0 %1734 }
 0x82a   : > { %3535 = vmatmul.mubr.msk.bf16.vlgmr.msra.gmra.mrb[8].mxu0 %vm1354_vm1, %v1735_v55 }
 0x82b   : > { %3558 = vmatprep.mubr.msk.bf16.mxu0 %vm4331_vm0, %v4330_v3 }
 0x82c   : > { %v3883_v56 = vpop.eup %3882 }
 0x82d   : > { %v1624_v57 = vmul.f32 %v3883_v56, %v3881_v51 }
 0x82f   : > { %v1625_v58 = vpack.c.bf16 %v1624_v57, %v1624_v57  ;;  %v3786_v57 = vld [vmem:[%s4937_s18] sm:$0xff]  }
 0x831   : > { %3523 = vmatmul.mubr.msk.bf16.vlgmr.msra.gmra.mrb[16].mxu1 %vm1449_vm3, %v1625_v58  ;;  %v3787_v58 = vld [vmem:[%s4937_s18 + $0x8] sm:$0xff]  }
 0x832   : > { %3527 = vmatpush3.bf16.xpose.msra.mxu1 %v1692_v59  ;;  %3528 = vmatprep.mubr.msk.bf16.mxu1 %vm4331_vm0, %v4330_v3  ;;  %v3788_v59 = vld [vmem:[%s4937_s18 + $0x10] sm:$0xff]  }
 0x833   : > { %3538 = vmatprep.subr.bf16.mxu1 %v4330_v3 }
 0x839   : > { %3529 = vmatmul.mubr.msk.bf16.vlgmr.msra.gmra.mrb[20].mxu1 %vm1354_vm1, %v1685_v60  ;;  %v3789_v60 = vld [vmem:[%s4937_s18 + $0x18] sm:$0xff]  }
 0x83a   : > { %3540 = vmatprep.mubr.msk.bf16.mxu1 %vm4331_vm0, %v4330_v3 }
 0x8fd   : > { %v1778_v62 = vpop.f32.mrb[8].mxu0 }
 0x8fe   : > { %v3536_v0 = vpop.f32.mrb[9].mxu0 }
 0x8ff   : > { %v1781_v1 = vpop.f32.mrb[10].mxu0  ;;  %v3791_v0 = vld [vmem:[%s4937_s18 + $0x28] sm:$0xff]  }
 0x900   : > { %v3537_v2 = vpop.f32.mrb[11].mxu0  ;;  %v3792_v1 = vld [vmem:[%s4937_s18 + $0x30] sm:$0xff]  }
 0x901   : > { %v3793_v2 = vld [vmem:[%s4937_s18 + $0x38] sm:$0xff]  }
 0x904   : > { %v5156_v4 = vpop.f32.mrb[16].mxu1 }
 0x905   : > { %v3524_v5 = vpop.f32.mrb[17].mxu1 }
 0x906   : > { %v1672_v6 = vpop.f32.mrb[18].mxu1 }
 0x907   : > { %v3525_v8 = vpop.f32.mrb[19].mxu1 }
 0x90c   : > { %v1728_v9 = vpop.f32.mrb[20].mxu1 }
 0x90d   : > { %v1779_v11 = vadd.f32 %v1778_v62, %v1728_v9  ;;  %v3530_v12 = vpop.f32.mrb[21].mxu1  ;;  %v3790_v62 = vld [vmem:[%s4937_s18 + $0x20] sm:$0xff]  }
 0x90e   : > { %v1731_v13 = vpop.f32.mrb[22].mxu1 }
 0x90f   : > { %v1784_v14 = vmul.f32 0.17677669, %v1779_v11  ;;  %v3531_v15 = vpop.f32.mrb[23].mxu1  ;;  %v3796_v13 = vld [vmem:[%s5547_s0 + $0x4] ss:$16 sps:$4 sm:$0xff]  }
 0x910   : > { %v3799_v15 = vld [vmem:[%s5547_s0 + $0xc] ss:$16 sps:$4 sm:$0xff]  }
 0x911   : > { %v1785_v16 = vadd.f32 %v1784_v14, %v5106_v10  ;;  %v3797_v14 = vld [vmem:[%s5547_s0 + $0x8] ss:$16 sps:$4 sm:$0xff]  }
 0x913   : > { %v1786_v17 = vsel %vm1449_vm3, %v1785_v16, -inf }
 0x914   : > { %1787 = vmax.xlane.f32.xlu1 %v1786_v17  ;;  %v3805_v17 = vld [vmem:[%s5547_s0 + $0x2c] ss:$16 sps:$4 sm:$0xff]  }
 0x925   : > { %1857 = vrot.lane.b32.xlu1 %v5073_v61, %s4337_s29 }
 0x929   : > { %1855 = vrot.lane.b32.xlu1 %v5077_v63, %s4337_s29 }
 0x92d   : > { %1905 = vrot.lane.b32.xlu1 %v5077_v63, %s4338_s30 }
 0x9a1   : > { %v1788_v18 = vpop.xlane.xlu1 %1787 }
 0x9a2   : > { %v1789_v19 = vsub.f32 %v1785_v16, %v1788_v18  ;;  %v3802_v16 = vld [vmem:[%s5547_s0 + $0x24] ss:$16 sps:$4 sm:$0xff]   ;;  %v3800_v18 = vld [vmem:[%s5547_s0 + $0x20] ss:$16 sps:$4 sm:$0xff]  }
 0x9a4   : > { %v1790_v20 = vmul.f32 1.442695, %v1789_v19  ;;  %v3803_v19 = vld [vmem:[%s5547_s0 + $0x28] ss:$16 sps:$4 sm:$0xff]  }
 0x9a5   : > { %v1858_v27 = vpop.permute.xlu1 %1857 }
 0x9a6   : > { %3884 = vpow2.f32 %v1790_v20  ;;  %v1863_v29 = vsel %vm1354_vm1, %v1858_v27, 0  ;;  %v3808_v20 = vld [vmem:[%s5547_s0 + $0x44] ss:$16 sps:$4 sm:$0xff]  }
 0x9a9   : > { %v1856_v30 = vpop.permute.xlu1 %1855 }
 0x9ad   : > { %v1906_v32 = vpop.permute.xlu1 %1905 }
 0x9b0   : > { %v3885_v21 = vpop.eup %3884 }
 0x9b1   : > { %v1792_v22 = vsel %vm1449_vm3, %v3885_v21, 0.0 }
 0x9b2   : > { %1793 = vadd.xlane.f32.xlu0 %v1792_v22  ;;  %v3806_v22 = vld [vmem:[%s5547_s0 + $0x40] ss:$16 sps:$4 sm:$0xff]  }
 0x9c8   : > { %1798 = vrot.lane.b32.xlu0 %v5094_v7, %s4332_s24 }
 0x9cc   : > { %1907 = vrot.lane.b32.xlu0 %v5073_v61, %s4338_s30 }
 0xa3f   : > { %v1794_v23 = vpop.xlane.xlu0 %1793 }
 0xa40   : > { %3886 = vrcp.f32 %v1794_v23  ;;  %v3809_v23 = vld [vmem:[%s5547_s0 + $0x48] ss:$16 sps:$4 sm:$0xff]  }
 0xa43   : > { %v1799_v24 = vpop.permute.xlu0 %1798 }
 0xa44   : > { %v1804_v25 = vsel %vm1465_vm2, %v1799_v24, 0  ;;  %v3233_v24 = vld [vmem:[%s963_s9] ss:$0 sm:$0xff] }
 0xa45   : > { %3539 = vmatpush3.bf16.msra.mxu1 %v1804_v25 }
 0xa46   : > { %3544 = vmatprep.subr.bf16.mxu1 %v4330_v3 }
 0xa47   : > { %v1908_v61 = vpop.permute.xlu0 %1907 }
 0xa48   : > { %v1913_v31 = vsel %vm1354_vm1, %v1908_v61, 0 }
 0xa4a   : > { %v3887_v63 = vpop.eup %3886 }
 0xa4b   : > { %v1796_v26 = vmul.f32 %v3887_v63, %v3885_v21  ;;  %v3811_v21 = vld [vmem:[%s5547_s0 + $0x4c] ss:$16 sps:$4 sm:$0xff]  }
 0xa4d   : > { %v1797_v28 = vpack.c.bf16 %v1796_v26, %v1796_v26 }
 0xa4f   : > { %3541 = vmatmul.mubr.msk.bf16.vlgmr.msra.gmra.mrb[24].mxu1 %vm1449_vm3, %v1797_v28  ;;  %v3910_v28 = vld [vmem:[#allocation2] sm:$0xff] }
 0xa50   : > { %3545 = vmatpush3.bf16.xpose.msra.mxu1 %v1863_v29  ;;  %3546 = vmatprep.mubr.msk.bf16.mxu1 %vm4331_vm0, %v4330_v3 }
 0xa51   : > { %3550 = vmatprep.subr.bf16.mxu1 %v4330_v3 }
 0xa57   : > { %3547 = vmatmul.mubr.msk.bf16.vlgmr.msra.gmra.mrb[28].mxu1 %vm1354_vm1, %v1856_v30 }
 0xa58   : > { %3551 = vmatpush3.bf16.xpose.msra.mxu1 %v1913_v31  ;;  %3552 = vmatprep.mubr.msk.bf16.mxu1 %vm4331_vm0, %v4330_v3  ;;  %v3814_v31 = vld [vmem:[%s5547_s0 + $0x64] ss:$16 sps:$4 sm:$0xff]  }
 0xa59   : > { %2369 = vmatprep.subr.bf16.mxu1 %v3796_v13  ;;  %v3857_v13 = vld [vmem:[%s4983_s3 + $0x98] sm:$0xff]  }
 0xa63   : > { %3553 = vmatmul.mubr.msk.bf16.vlgmr.msra.gmra.mrb[28].mxu1 %vm1354_vm1, %v1906_v32  ;;  %v3817_v32 = vld [vmem:[%s5547_s0 + $0x6c] ss:$16 sps:$4 sm:$0xff]  }
 0xb22   : > { %v1840_v33 = vpop.f32.mrb[24].mxu1 }
 0xb23   : > { %v3542_v34 = vpop.f32.mrb[25].mxu1  ;;  %v3324_v44 = vpack.c.bf16 %v1840_v33, %v1840_v33  ;;  %v3812_v33 = vld [vmem:[%s5547_s0 + $0x60] ss:$16 sps:$4 sm:$0xff]  }
 0xb24   : > { %v1843_v35 = vpop.f32.mrb[26].mxu1  ;;  %v3815_v34 = vld [vmem:[%s5547_s0 + $0x68] ss:$16 sps:$4 sm:$0xff]  }
 0xb25   : > { %v3543_v36 = vpop.f32.mrb[27].mxu1  ;;  %v3818_v35 = vld [vmem:[%s5547_s0 + $0x80] ss:$16 sps:$4 sm:$0xff]  }
 0xb26   : > { %v3820_v36 = vld [vmem:[%s5547_s0 + $0x84] ss:$16 sps:$4 sm:$0xff]  }
 0xb36   : > { %v1949_v37 = vpop.f32.mrb[28].mxu1 }
 0xb37   : > { %v1955_v38 = vmul.f32 0.17677669, %v1949_v37  ;;  %v3554_v39 = vpop.f32.mrb[29].mxu1  ;;  %v3821_v37 = vld [vmem:[%s5547_s0 + $0x88] ss:$16 sps:$4 sm:$0xff]  }
 0xb38   : > { %v1952_v40 = vpop.f32.mrb[30].mxu1  ;;  %v3826_v39 = vld [vmem:[%s5547_s0 + $0xa4] ss:$16 sps:$4 sm:$0xff]  }
 0xb39   : > { %v3555_v41 = vpop.f32.mrb[31].mxu1  ;;  %v1956_v42 = vadd.f32 %v1955_v38, %v5106_v10  ;;  %v3823_v38 = vld [vmem:[%s5547_s0 + $0x8c] ss:$16 sps:$4 sm:$0xff]  }
 0xb3a   : > { %v3829_v40 = vld [vmem:[%s5547_s0 + $0xac] ss:$16 sps:$4 sm:$0xff]   ;;  %v3824_v41 = vld [vmem:[%s5547_s0 + $0xa0] ss:$16 sps:$4 sm:$0xff]  }
 0xb3b   : > { %v1957_v43 = vsel %vm1449_vm3, %v1956_v42, -inf }
 0xb3c   : > { %1958 = vmax.xlane.f32.xlu0 %v1957_v43  ;;  %v3832_v43 = vld [vmem:[%s5547_s0 + $0xc4] ss:$16 sps:$4 sm:$0xff]  }
 0xb52   : > { %1969 = vrot.lane.b32.xlu0 %v5094_v7, %s4336_s16  ;;  %v3323_v7 = vpack.c.bf16 %v5156_v4, %v5156_v4 }
 0xb56   : > { %1850 = vrot.lane.b32.xlu0 %v3324_v44, %s4332_s24  ;;  %v3835_v44 = vld [vmem:[%s5547_s0 + $0xcc] ss:$16 sps:$4 sm:$0xff]  }
 0xbc9   : > { %v1959_v45 = vpop.xlane.xlu0 %1958 }
 0xbca   : > { %v1960_v46 = vsub.f32 %v1956_v42, %v1959_v45  ;;  %v3827_v42 = vld [vmem:[%s5547_s0 + $0xa8] ss:$16 sps:$4 sm:$0xff]   ;;  %v4339_v45 = vmov 0  }
 0xbcb   : > { %2401 = vmatprep.mubr.bf16.mxu1 %v4339_v45 }
 0xbcc   : > { %v1961_v47 = vmul.f32 1.442695, %v1960_v46  ;;  %v3830_v46 = vld [vmem:[%s5547_s0 + $0xc0] ss:$16 sps:$4 sm:$0xff]  }
 0xbcd   : > { %v1970_v48 = vpop.permute.xlu0 %1969 }
 0xbce   : > { %3888 = vpow2.f32 %v1961_v47  ;;  %v1975_v49 = vsel %vm1465_vm2, %v1970_v48, 0  ;;  %v3833_v47 = vld [vmem:[%s5547_s0 + $0xc8] ss:$16 sps:$4 sm:$0xff]   ;;  %v3838_v48 = vld [vmem:[%s5547_s0 + $0xe4] ss:$16 sps:$4 sm:$0xff]  }
 0xbcf   : > { %3557 = vmatpush3.bf16.msra.mxu0 %v1975_v49  ;;  %v3841_v49 = vld [vmem:[%s5547_s0 + $0xec] ss:$16 sps:$4 sm:$0xff]  }
 0xbd0   : > { %3562 = vmatprep.subr.bf16.mxu0 %v4330_v3 }
 0xbd1   : > { %v1851_v53 = vpop.permute.xlu0 %1850 }
 0xbd8   : > { %v3889_v10 = vpop.eup %3888 }
 0xbd9   : > { %v1963_v50 = vsel %vm1449_vm3, %v3889_v10, 0.0 }
 0xbda   : > { %1964 = vadd.xlane.f32.xlu1 %v1963_v50  ;;  %v3839_v50 = vld [vmem:[%s5547_s0 + $0xe8] ss:$16 sps:$4 sm:$0xff]  }
 0xbeb   : > { %1679 = vrot.lane.b32.xlu1 %v3323_v7, %s4336_s16 }
 0xc67   : > { %v1965_v51 = vpop.xlane.xlu1 %1964 }
 0xc68   : > { %3890 = vrcp.f32 %v1965_v51 }
 0xc6b   : > { %v1680_v52 = vpop.permute.xlu1 %1679 }
 0xc6c   : > { %1683 = vst.msk [vmem:[#allocation3] sm:$0xf] %vm1682_vm5, %v1680_v52 }
 0xc6d   : > { %1854 = vst.msk [vmem:[#allocation3] sm:$0xf] %vm1853_vm6, %v1851_v53 }
 0xc72   : > { %v3891_v54 = vpop.eup %3890 }
 0xc73   : > { %v1967_v55 = vmul.f32 %v3891_v54, %v3889_v10  ;;  %v3836_v10 = vld [vmem:[%s5547_s0 + $0xe0] ss:$16 sps:$4 sm:$0xff]  }
 0xc74   : > { %v3242_v54 = vld [vmem:[%s966_s19] ss:$0 sm:$0xff] }
 0xc75   : > { %v1968_v56 = vpack.c.bf16 %v1967_v55, %v1967_v55 }
 0xc77   : > { %3559 = vmatmul.mubr.msk.bf16.vlgmr.msra.gmra.mrb[12].mxu0 %vm1449_vm3, %v1968_v56 }
 0xc78   : > { %3578 = vmatprep.mubr.msk.bf16.mxu0 %vm4331_vm0, %v4330_v3  ;;  %3563 = vmatpush3.bf16.msra.mxu0 %v3786_v57 }
 0xc79   : > { %3564 = vmatprep.subr.bf16.mxu0 %v4330_v3 }
 0xc7c   : > { %3565 = vmatpush3.bf16.msra.mxu0 %v3787_v58  ;;  %v3842_v58 = vld [vmem:[%s4983_s3 + $0x40] sm:$0xff]  }
 0xc7d   : > { %3566 = vmatprep.subr.bf16.mxu0 %v4330_v3 }
 0xc80   : > { %3567 = vmatpush3.bf16.msra.mxu0 %v3788_v59  ;;  %v3843_v59 = vld [vmem:[%s4983_s3 + $0xc0] sm:$0xff]  }
 0xc81   : > { %3568 = vmatprep.subr.bf16.mxu0 %v4330_v3 }
 0xc84   : > { %3569 = vmatpush3.bf16.msra.mxu0 %v3789_v60  ;;  %v3844_v60 = vld [vmem:[%s4983_s3] sm:$0xff]  }
 0xc85   : > { %3570 = vmatprep.subr.bf16.mxu0 %v4330_v3 }
 0xc88   : > { %3571 = vmatpush3.bf16.msra.mxu0 %v3790_v62  ;;  %v3845_v62 = vld [vmem:[%s4983_s3 + $0x80] sm:$0xff]  }
 0xc89   : > { %3572 = vmatprep.subr.bf16.mxu0 %v4330_v3 }
 0xc8c   : > { %3573 = vmatpush3.bf16.msra.mxu0 %v3791_v0  ;;  %v3846_v0 = vld [vmem:[%s4983_s3 + $0x48] sm:$0xff]  }
 0xc8d   : > { %3574 = vmatprep.subr.bf16.mxu0 %v4330_v3 }
 0xc90   : > { %3575 = vmatpush3.bf16.msra.mxu0 %v3792_v1  ;;  %v3847_v1 = vld [vmem:[%s4983_s3 + $0xc8] sm:$0xff]  }
 0xc91   : > { %3576 = vmatprep.subr.bf16.mxu0 %v4330_v3  ;;  %v3794_v3 = vld [vmem:[%s5547_s0] ss:$16 sps:$4 sm:$0xff]  }
 0xc92   : > { %2370 = vmatpush1.bf16.msra.mxu1 %v3794_v3  ;;  %v3856_v3 = vld [vmem:[%s4983_s3 + $0x18] sm:$0xff]  }
 0xc93   : > { %2371 = vmatprep.subr.bf16.mxu1 %v3802_v16  ;;  %v3860_v16 = vld [vmem:[%s4983_s3 + $0x20] sm:$0xff]  }
 0xc94   : > { %3577 = vmatpush3.bf16.msra.mxu0 %v3793_v2  ;;  %v3848_v2 = vld [vmem:[%s4983_s3 + $0x8] sm:$0xff]  }
 0xc95   : > { %2410 = vmatprep.subr.bf16.mxu0 %v3799_v15  ;;  %v3859_v15 = vld [vmem:[%s4983_s3 + $0xe0] sm:$0xff]  }
 0xc96   : > { %2372 = vmatpush1.bf16.msra.mxu1 %v3800_v18  ;;  %v3862_v18 = vld [vmem:[%s4983_s3 + $0x68] sm:$0xff]  }
 0xc97   : > { %2373 = vmatprep.subr.bf16.mxu1 %v3808_v20  ;;  %v3864_v20 = vld [vmem:[%s4983_s3 + $0x28] sm:$0xff]  }
 0xc9a   : > { %2374 = vmatpush1.bf16.msra.mxu1 %v3806_v22  ;;  %v3866_v22 = vld [vmem:[%s4983_s3 + $0x70] sm:$0xff]  }
 0xc9b   : > { %2375 = vmatprep.subr.bf16.mxu1 %v3814_v31 }
 0xc9e   : > { %2376 = vmatpush1.bf16.msra.mxu1 %v3812_v33  ;;  %v2187_v33 = vld [vmem:[%s4981_s21] sm:$0xf] }
 0xc9f   : > { %2377 = vmatprep.subr.bf16.mxu1 %v3820_v36 }
 0xca2   : > { %2378 = vmatpush1.bf16.msra.mxu1 %v3818_v35 }
 0xca3   : > { %2379 = vmatprep.subr.bf16.mxu1 %v3826_v39 }
 0xca6   : > { %2380 = vmatpush1.bf16.msra.mxu1 %v3824_v41 }
 0xca7   : > { %2381 = vmatprep.subr.bf16.mxu1 %v3832_v43 }
 0xcaa   : > { %2382 = vmatpush1.bf16.msra.mxu1 %v3830_v46 }
 0xcab   : > { %2383 = vmatprep.subr.bf16.mxu1 %v3838_v48 }
 0xcae   : > { %2384 = vmatpush1.bf16.msra.mxu1 %v3836_v10 }
 0xcaf   : > { %3386 = vmatprep.subr.bf16.mxu1 %v3842_v58 }
 0xd4a   : > { %v2011_v4 = vpop.f32.mrb[12].mxu0 }
 0xd4b   : > { %v3325_v5 = vpack.c.bf16 %v2011_v4, %v2011_v4  ;;  %v3560_v6 = vpop.f32.mrb[13].mxu0  ;;  %v3849_v4 = vld [vmem:[%s4983_s3 + $0x88] sm:$0xff]  }
 0xd4c   : > { %v2014_v8 = vpop.f32.mrb[14].mxu0  ;;  %v3851_v6 = vld [vmem:[%s4983_s3 + $0xd0] sm:$0xff]  }
 0xd4d   : > { %2021 = vrot.lane.b32.xlu1 %v3325_v5, %s4335_s5  ;;  %v3561_v9 = vpop.f32.mrb[15].mxu0  ;;  %v3850_v5 = vld [vmem:[%s4983_s3 + $0x50] sm:$0xff]  }
 0xd4e   : > { %v3852_v8 = vld [vmem:[%s4983_s3 + $0x10] sm:$0xff]  }
 0xd4f   : > { %v3853_v9 = vld [vmem:[%s4983_s3 + $0x90] sm:$0xff]  }
 0xdbf   : > { %v2022_v11 = vpop.permute.xlu1 %2021 }
 0xdc0   : > { %2025 = vst.msk [vmem:[#allocation3] sm:$0xf] %vm2024_vm7, %v2022_v11  ;;  %v3854_v11 = vld [vmem:[%s4983_s3 + $0x58] sm:$0xff]  }
 0xdc7   : > { %v2026_v12 = vld [vmem:[#allocation3] sm:$0xf] }
 0xdc8   : > { %3579 = vmatmul.mubr.bf16.vlgmr.msra.gmra.mrb[16].mxu0 %v2026_v12  ;;  %v3855_v12 = vld [vmem:[%s4983_s3 + $0xd8] sm:$0xff]  }
 0xdc9   : > { %2411 = vmatpush1.bf16.msra.mxu0 %v3797_v14  ;;  %2442 = vmatprep.mubr.bf16.mxu0 %v4339_v45  ;;  %v3858_v14 = vld [vmem:[%s4983_s3 + $0x60] sm:$0xff]  }
 0xdca   : > { %2412 = vmatprep.subr.bf16.mxu0 %v3805_v17  ;;  %v3861_v17 = vld [vmem:[%s4983_s3 + $0xa0] sm:$0xff]  }
 0xdcd   : > { %2413 = vmatpush1.bf16.msra.mxu0 %v3803_v19  ;;  %v3863_v19 = vld [vmem:[%s4983_s3 + $0xe8] sm:$0xff]  }
 0xdce   : > { %2414 = vmatprep.subr.bf16.mxu0 %v3811_v21  ;;  %v3865_v21 = vld [vmem:[%s4983_s3 + $0xa8] sm:$0xff]  }
 0xdd1   : > { %2415 = vmatpush1.bf16.msra.mxu0 %v3809_v23  ;;  %v3867_v23 = vld [vmem:[%s4983_s3 + $0xf0] sm:$0xff]  }
 0xdd2   : > { %2416 = vmatprep.subr.bf16.mxu0 %v3817_v32 }
 0xdd5   : > { %2417 = vmatpush1.bf16.msra.mxu0 %v3815_v34 }
 0xdd6   : > { %2418 = vmatprep.subr.bf16.mxu0 %v3823_v38 }
 0xdd9   : > { %2419 = vmatpush1.bf16.msra.mxu0 %v3821_v37 }
 0xdda   : > { %2420 = vmatprep.subr.bf16.mxu0 %v3829_v40 }
 0xddd   : > { %2421 = vmatpush1.bf16.msra.mxu0 %v3827_v42 }
 0xdde   : > { %2422 = vmatprep.subr.bf16.mxu0 %v3835_v44 }
 0xde1   : > { %2423 = vmatpush1.bf16.msra.mxu0 %v3833_v47 }
 0xde2   : > { %2424 = vmatprep.subr.bf16.mxu0 %v3841_v49 }
 0xde5   : > { %2425 = vmatpush1.bf16.msra.mxu0 %v3839_v50 }
 0xde6   : > { %3408 = vmatprep.subr.bf16.mxu0 %v3843_v59 }
 0xe9b   : > { %v2132_v25 = vpop.f32.mrb[16].mxu0 }
 0xe9c   : > { %v2133_v63 = vadd.f32 %v3233_v24, %v2132_v25  ;;  %v3580_v26 = vpop.f32.mrb[17].mxu0  ;;  %v3868_v24 = vld [vmem:[%s4983_s3 + $0x30] sm:$0xff]  }
 0xe9d   : > { %v2135_v27 = vpop.f32.mrb[18].mxu0  ;;  %v3869_v25 = vld [vmem:[%s4983_s3 + $0xb0] sm:$0xff]   ;;  %v3871_v26 = vld [vmem:[%s4983_s3 + $0xf8] sm:$0xff]  }
 0xe9e   : > { %v5226_v29 = vadd.f32 %v3910_v28, %v2133_v63  ;;  %v3581_v61 = vpop.f32.mrb[19].mxu0  ;;  %v3870_v63 = vld [vmem:[%s4983_s3 + $0x78] sm:$0xff]  }
 0xe9f   : > { %v3872_v27 = vld [vmem:[%s4983_s3 + $0x38] sm:$0xff]   ;;  %v2189_v61 = vlaneseq }
 0xea0   : > { %v2140_v30 = vmul.f32 %v5226_v29, %v5226_v29  ;;  %v3873_v28 = vld [vmem:[%s4983_s3 + $0xb8] sm:$0xff]  }
 0xea2   : > { %2141 = vadd.xlane.f32.xlu0 %v2140_v30  ;;  %v2190_v30 = vshrl.u32 %v2189_v61, 7 }
 0xea4   : > { %v2191_v31 = vsub.s32 0, %v2190_v30  ;;  %v2199_v32 = vsub.s32 2, %v2190_v30  ;;  %v2195_v34 = vsub.s32 1, %v2190_v30  ;;  %v2203_v35 = vsub.s32 3, %v2190_v30 }
 0xea6   : > { %v2192_v36 = vrot.slane %v2187_v33, %v2191_v31  ;;  %v2200_v37 = vrot.slane %v2187_v33, %v2199_v32  ;;  %v2196_v38 = vrot.slane %v2187_v33, %v2195_v34  ;;  %v2204_v39 = vrot.slane %v2187_v33, %v2203_v35 }
 0xf2f   : > { %v2142_v7 = vpop.xlane.xlu0 %2141 }
 0xf30   : > { %v2143_v51 = vmul.f32 0.0078125, %v2142_v7 }
 0xf32   : > { %v2144_v52 = vadd.f32 1e-06, %v2143_v51 }
 0xf34   : > { %3892 = vrsqrt.f32 %v2144_v52 }
 0xf3e   : > { %v3893_v53 = vpop.eup %3892 }
 0xf3f   : > { %v2146_v55 = vmul.f32 %v3893_v53, %v5226_v29 }
 0xf41   : > { %v2153_v56 = vmul.f32 %v3242_v54, %v2146_v55 }
 0xf43   : > { %v2154_v57 = vpack.c.bf16 %v2153_v56, %v2153_v56 }
 0xf45   : > { %2402 = vmatmul.mubr.bf16.vlgmr.msra.gmra.mrb[32].mxu1 %v2154_v57  ;;  %2443 = vmatmul.mubr.bf16.vlgmr.msra.gmra.mrb[20].mxu0 %v2154_v57 }
 0xf46   : > { %3387 = vmatpush3.bf16.msra.mxu1 %v3844_v60  ;;  %3409 = vmatpush3.bf16.msra.mxu0 %v3845_v62 }
 0xf47   : > { %3388 = vmatprep.subr.bf16.mxu1 %v3846_v0  ;;  %3410 = vmatprep.subr.bf16.mxu0 %v3847_v1 }
 0xf4a   : > { %3389 = vmatpush3.bf16.msra.mxu1 %v3848_v2  ;;  %3411 = vmatpush3.bf16.msra.mxu0 %v3849_v4 }
 0xf4b   : > { %3390 = vmatprep.subr.bf16.mxu1 %v3850_v5  ;;  %3412 = vmatprep.subr.bf16.mxu0 %v3851_v6 }
 0xf4e   : > { %3391 = vmatpush3.bf16.msra.mxu1 %v3852_v8  ;;  %3413 = vmatpush3.bf16.msra.mxu0 %v3853_v9 }
 0xf4f   : > { %3392 = vmatprep.subr.bf16.mxu1 %v3854_v11  ;;  %3414 = vmatprep.subr.bf16.mxu0 %v3855_v12 }
 0xf52   : > { %3393 = vmatpush3.bf16.msra.mxu1 %v3856_v3  ;;  %3415 = vmatpush3.bf16.msra.mxu0 %v3857_v13 }
 0xf53   : > { %3394 = vmatprep.subr.bf16.mxu1 %v3858_v14  ;;  %3416 = vmatprep.subr.bf16.mxu0 %v3859_v15 }
 0xf56   : > { %3395 = vmatpush3.bf16.msra.mxu1 %v3860_v16  ;;  %3417 = vmatpush3.bf16.msra.mxu0 %v3861_v17  ;;  %v3279_v16 = vld [vmem:[%s973_s25] ss:$0 sm:$0xff] }
 0xf57   : > { %3396 = vmatprep.subr.bf16.mxu1 %v3862_v18  ;;  %3418 = vmatprep.subr.bf16.mxu0 %v3863_v19 }
 0xf5a   : > { %3397 = vmatpush3.bf16.msra.mxu1 %v3864_v20  ;;  %3419 = vmatpush3.bf16.msra.mxu0 %v3865_v21 }
 0xf5b   : > { %3398 = vmatprep.subr.bf16.mxu1 %v3866_v22  ;;  %3420 = vmatprep.subr.bf16.mxu0 %v3867_v23 }
 0xf5e   : > { %3399 = vmatpush3.bf16.msra.mxu1 %v3868_v24  ;;  %3421 = vmatpush3.bf16.msra.mxu0 %v3869_v25 }
 0xf5f   : > { %3400 = vmatprep.subr.bf16.mxu1 %v3870_v63  ;;  %3422 = vmatprep.subr.bf16.mxu0 %v3871_v26 }
 0xf62   : > { %3401 = vmatpush3.bf16.msra.mxu1 %v3872_v27  ;;  %3423 = vmatpush3.bf16.msra.mxu0 %v3873_v28 }
0x1018   : > { %v2403_v40 = vpop.f32.mrb[32].mxu1  ;;  %v2444_v41 = vpop.f32.mrb[20].mxu0 }
0x1019   : > { %v2404_v42 = vadd.f32 %v2403_v40, %v2192_v36  ;;  %v2445_v43 = vadd.f32 %v2444_v41, %v2200_v37  ;;  %v2405_v44 = vpop.f32.mrb[33].mxu1  ;;  %v2446_v45 = vpop.f32.mrb[21].mxu0 }
0x101a   : > { %v2406_v46 = vadd.f32 %v2405_v44, %v2196_v38  ;;  %v2447_v47 = vadd.f32 %v2446_v45, %v2204_v39  ;;  %v2407_v48 = vpop.f32.mrb[34].mxu1  ;;  %v2448_v49 = vpop.f32.mrb[22].mxu0 }
0x101b   : > { %v3275_v10 = vmul.f32 -1.442695, %v2404_v42  ;;  %v3277_v50 = vmul.f32 -1.442695, %v2445_v43  ;;  %v2408_v7 = vpop.f32.mrb[35].mxu1  ;;  %v2449_v51 = vpop.f32.mrb[23].mxu0 }
0x101c   : > { %v3276_v52 = vmul.f32 -1.442695, %v2406_v46  ;;  %v3278_v53 = vmul.f32 -1.442695, %v2447_v47 }
0x101d   : > { %3894 = vpow2.f32 %v3275_v10 }
0x101e   : > { %3896 = vpow2.f32 %v3277_v50 }
0x101f   : > { %3898 = vpow2.f32 %v3276_v52 }
0x1020   : > { %3900 = vpow2.f32 %v3278_v53 }
0x1027   : > { %v3895_v54 = vpop.eup %3894 }
0x1028   : > { %v3897_v55 = vpop.eup %3896  ;;  %v2463_v56 = vadd.f32 1.0, %v3895_v54 }
0x1029   : > { %v3899_v57 = vpop.eup %3898  ;;  %v2465_v58 = vadd.f32 1.0, %v3897_v55 }
0x102a   : > { %v3901_v59 = vpop.eup %3900  ;;  %3902 = vrcp.f32 %v2463_v56  ;;  %v2464_v60 = vadd.f32 1.0, %v3899_v57 }
0x102b   : > { %3904 = vrcp.f32 %v2465_v58  ;;  %v2466_v62 = vadd.f32 1.0, %v3901_v59 }
0x102c   : > { %3906 = vrcp.f32 %v2464_v60 }
0x102d   : > { %3908 = vrcp.f32 %v2466_v62 }
0x1034   : > { %v3903_v0 = vpop.eup %3902 }
0x1035   : > { %v3905_v1 = vpop.eup %3904  ;;  %v2475_v4 = vmul.f32 %v3903_v0, %v2404_v42 }
0x1036   : > { %v3907_v2 = vpop.eup %3906  ;;  %v2477_v6 = vmul.f32 %v3905_v1, %v2445_v43 }
0x1037   : > { %v3909_v5 = vpop.eup %3908  ;;  %v2476_v8 = vmul.f32 %v3907_v2, %v2406_v46  ;;  %v2479_v12 = vpack.c.bf16 %v2475_v4, %v2475_v4 }
0x1038   : > { %v2478_v9 = vmul.f32 %v3909_v5, %v2447_v47  ;;  %v2481_v13 = vpack.c.bf16 %v2477_v6, %v2477_v6 }
0x1039   : > { %v2480_v11 = vpack.c.bf16 %v2476_v8, %v2476_v8 }
0x103a   : > { %v2482_v3 = vpack.c.bf16 %v2478_v9, %v2478_v9 }
0x103b   : > { %2778 = vmatprep.mubr.bf16.mxu1 %v2480_v11 }
0x103c   : > { %2818 = vmatprep.mubr.bf16.mxu0 %v2482_v3  ;;  %2779 = vmatmul.mubr.bf16.vlgmr.msra.gmra.mrb[36].mxu1 %v2479_v12 }
0x103d   : > { %2819 = vmatmul.mubr.bf16.vlgmr.msra.gmra.mrb[24].mxu0 %v2481_v13 }
0x110f   : > { %v3402_v14 = vpop.f32.mrb[36].mxu1 }
0x1110   : > { %v3424_v15 = vpop.f32.mrb[24].mxu0  ;;  %v3403_v17 = vpop.f32.mrb[37].mxu1 }
0x1111   : > { %v3404_v18 = vadd.f32 %v3403_v17, %v3402_v14  ;;  %v3425_v19 = vpop.f32.mrb[25].mxu0  ;;  %v3405_v20 = vpop.f32.mrb[38].mxu1 }
0x1112   : > { %v3426_v21 = vadd.f32 %v3425_v19, %v3424_v15  ;;  %v3427_v22 = vpop.f32.mrb[26].mxu0  ;;  %v3406_v23 = vpop.f32.mrb[39].mxu1 }
0x1113   : > { %v2781_v24 = vadd.f32 %v3404_v18, %v3279_v16  ;;  %v3428_v25 = vpop.f32.mrb[27].mxu0  ;;  %2831 = sbr.rel (%p3312_p1) target bundleno = 4378 (0x111a), region = 136 }
0x1115   : > { %v2821_v63 = vadd.f32 %v3426_v21, %v2781_v24 }
0x1117   : > { %v2826_v26 = vadd.f32 %v2821_v63, %v5226_v29 }
0x1119   : > { %2827 = vst [vmem:[#allocation2] sm:$0xff] %v2826_v26  ;;  %2832 = vst [vmem:[%s4987_s11] sm:$0xff] (!%p3312_p1), %v2826_v26 }
0x111a PF: > { %s5552_s22 = sld [smem:[#allocation32_spill]]  ;;  %s5554_s24 = sld [smem:[#allocation67_spill]] }
0x111b   : > { %s5553_s25 = sld [smem:[#allocation43_spill]]  ;;  %s2847_s28 = sshll.u32 %s4987_s11, 4  ;;  %s2848_s28 = int_to_ptr.vmem [resolvable:$true] %s2847_s28 }
0x111c   : > { %s2834_s14 = scalar_lea.sflag [#allocation6], %s4905_s7  ;;  %s4177_s4 = scalar_lea.vmem %s2848_s28, 128 }
0x111d   : > { %p4178_p11 = scmp.ne.s32.totalorder %s2848_s28, %s4177_s4  ;;  %s4340_s13 = smov [#allocation19]  }
0x111e   : > { %s4181_s1 = sshll.u32 %s4340_s13, 4  ;;  %s4182_s1 = int_to_ptr.vmem [resolvable:$false] %s4181_s1 }
0x111f   : > { %s4183_s15 = scalar_lea.vmem %s4182_s1, 256  ;;  %p4184_p9 = scmp.lt.s32.totalorder %s2848_s28, %s4182_s1 }
0x1120   : > { %s3314_s23 = sshll.u32 %s5552_s22, 7  ;;  %p4185_p5 = scmp.lt.s32.totalorder %s4183_s15, %s4177_s4 }
0x1121   : > { %s5301_s26 = scalar_lea.hbm %s5554_s24, %s3314_s23  ;;  %p5555_p3 = scmp.ne.s32.totalorder %s5553_s25, 0 }
0x1122   : > { %p4186_p8 = por %p4185_p5, %p4184_p9 }
0x1123   : > { %p4179_p7 = pnand %p4178_p11, %p5555_p3 }
0x1125   : > { %p4180_p2 = pneg %p4179_p7 }
0x1127   : > { %p4187_p4 = pnand %p4186_p8, %p4180_p2 }
0x1129   : > { %4190 = shalt.err (!%p4187_p4)
}
0x112a   : > { %s4191_s7 = scalar_lea.hbm %s5301_s26, 128  ;;  %s4195_s5 = scalar_lea.hbm %s5554_s24, 256 }
0x112b   : > { %p4192_p12 = scmp.ne.s32.totalorder %s5301_s26, %s4191_s7  ;;  %p4196_p10 = scmp.lt.u32.totalorder %s5301_s26, %s5554_s24 }
0x112c   : > { %p4197_p0 = scmp.lt.u32.totalorder %s4195_s5, %s4191_s7  ;;  %p4199_p11 = scmp.lt.u32.totalorder %s4191_s7, %s5301_s26 }
0x112d   : > { %p4193_p13 = pnand %p4192_p12, %p5555_p3 }
0x112e   : > { %p4198_p1 = por %p4197_p0, %p4196_p10 }
0x112f   : > { %p4194_p6 = pneg %p4193_p13 }
0x1130   : > { %p4200_p7 = por %p4199_p11, %p4198_p1 }
0x1132   : > { %p4201_p2 = pnand %p4200_p7, %p4194_p6 }
0x1134   : > { %4204 = shalt.err (!%p4201_p2)
}
0x1135   : > { %3617 = dma.vmem_to_hbm [thread:$0]  (%p5555_p3), %s2848_s28, 128, %s5301_s26, %s2834_s14  }
0x1136 PF: > { %s5556_s30 = sld [smem:[#allocation35_spill]]  ;;  %s5557_s0 = sld [smem:[#allocation28_spill]] }
0x1137   : > { %s5558_s18 = sld [smem:[#allocation46_spill]] }
0x113c   : > { %p3657_p9 = scmp.ge.s32.totalorder %s5556_s30, 2  ;;  %s2859_s2 = sand.u32 1, %s5557_s0  }
0x113d   : > { %p5559_p5 = scmp.ne.s32.totalorder %s5558_s18, 0  ;;  %s2860_s17 = scalar_lea.sflag [#allocation6], %s2859_s2 }
0x113f   : > { %p3649_p8 = pnand %p3657_p9, %p5559_p5 }
0x1141   : > { %4270 = dma.done.wait (!%p3649_p8), %s2860_s17, 128  }
0x1142   : > { %4272 = vsyncadd (!%p3649_p8), %s2860_s17, 4294967168  ;;  %s44_s2 = sadd.s32 1, %s5556_s30   ;;  %s5560_s27 = sld [smem:[#allocation26_spill]] }
0x1143   : > { %p41_p4 = scmp.ge.s32.totalorder %s44_s2, 6   ;;  %s5561_s28 = sld [smem:[#allocation27_spill]] }
0x1144   : > { %s5562_s29 = sld [smem:[#allocation45_spill]]  ;;  %s5563_s30 = sld [smem:[#allocation29_spill]] }
0x1145   : > { %s5564_s0 = sld [smem:[#allocation30_spill]]  ;;  %s5565_s19 = sld [smem:[#allocation47_spill]] }
0x1146   : > { %s5566_s1 = sld [smem:[#allocation33_spill]]  ;;  %s5567_s20 = sld [smem:[#allocation34_spill]] }
0x1147   : > { %s5568_s21 = sld [smem:[#allocation42_spill]]  ;;  %s5569_s22 = sld [smem:[#allocation44_spill]] }
0x1148   :  { %43 = sbr.rel (!%p41_p4) target bundleno = 36 (0x24), region = 249 }
0x114f   :  { %2865 = vsyncpa [#allocation5], 1 }
0x1150   :  { %2867 = vsyncpa [#allocation5 + $0x1], 1 }
0x1151   :  { %2868 = vsyncpa [#allocation8], 1 }
0x1152   :  { %2869 = vsyncpa [#allocation11], 1 }
0x1153   :  { %2871 = vsyncpa [#allocation11 + $0x1], 1 }
0x1154   :  { %2872 = vsyncpa [#allocation14], 1 }
0x1155   :  { %2874 = vsyncpa [#allocation14 + $0x1], 1 }
0x1156   :  { %2875 = vsyncpa [#allocation17], 1 }
0x1157   :  { %2877 = vsyncpa [#allocation17 + $0x1], 1 }
0x1158   :  { %2878 = vsyncpa [#allocation6], 1 }
0x1159   :  { %2880 = vsyncpa [#allocation6 + $0x1], 1 }

</bundles_post_ra>
